<compile_context>
chip_gen: v5e
topology: v5e:2x2
jax: 0.10.0
libtpu: 0.0.40
codegen_flags: <defaults>
</compile_context>

<pallas_src>
import functools

import jax
import jax.numpy as jnp
from jax.experimental import pallas as pl
from jax.experimental.pallas import tpu as pltpu

_EPS = 1e-5                      # torch BatchNorm2d default eps
_VMEM_LIMIT = 48 * 1024 * 1024   # explicit scoped-VMEM cap (below v7x's 64 MiB)
_VMEM_BUDGET = 20 * 1024 * 1024  # target working set when picking block sizes


def _round_up(x, m):
    return (x + m - 1) // m * m


def _largest_divisor_leq(n, cap):
    cap = max(1, min(n, cap))
    for d in range(cap, 0, -1):
        if n % d == 0:
            return d
    return 1


# -----------------------------------------------------------------------------
# SepConv block kernel (one grid step == B batch elements)
#   dw 3x3 stride-2 pad-1 (from parity-phase input, unit-stride taps)
#   -> 1x1 conv (BN1 scale folded) + bias + ReLU
#   -> dw 3x3 stride-1 pad-1 (8-aligned padded VMEM scratch, border-only zero)
#   -> 1x1 conv (BN2 scale folded) + bias + ReLU
#   -> (optionally) fused global average pool
# -----------------------------------------------------------------------------
def _sepconv_kernel(ph_ref, dw1_ref, pw1_ref, b1_ref, dw2_ref, pw2_ref, b2_ref,
                    o_ref, pad_ref, *, B, Ho, Wo, Cin, Cout, Wpad, fuse_gap):
    # ---- depthwise 3x3, stride 2, pad 1 -------------------------------------
    # ph_ref holds the zero-padded input split into its 4 (row, col) parity
    # phases, so tap (ki, kj) is a unit-stride window of phase
    # (ki % 2, kj % 2) at offset (ki // 2, kj // 2): no strided loads and no
    # 9x tap tensor in HBM.
    acc = jnp.zeros((B, Ho, Wo, Cin), jnp.float32)
    for ki in range(3):
        ro = ki // 2
        for kj in range(3):
            co = kj // 2
            p = 2 * (ki % 2) + (kj % 2)
            tap = ph_ref[:, p:p + 1, ro:ro + Ho, co:co + Wo, :]
            acc = acc + tap.reshape(B, Ho, Wo, Cin) * dw1_ref[ki * 3 + kj]

    # ---- 1x1 conv (Cin -> Cin, BN1 scale pre-folded) + bias + ReLU ----------
    lhs = acc.reshape(B * Ho * Wo, Cin).astype(pw1_ref.dtype)
    h = jnp.dot(lhs, pw1_ref[...], preferred_element_type=jnp.float32)
    h = jnp.maximum(h + b1_ref[...], 0.0).reshape(B, Ho, Wo, Cin)

    # ---- depthwise 3x3, stride 1, pad 1 via padded VMEM scratch -------------
    # Only the 1-wide border is zeroed each step (the interior is fully
    # overwritten); Wpad is 8-sublane aligned so the 9 shifted reads are plain
    # vector loads.
    # TODO(synk): a pltpu.roll + mask formulation would drop the VMEM round
    # trip entirely and move the shifts to the XLU.
    pad_ref[:, 0:1, :, :] = jnp.zeros((B, 1, Wpad, Cin), jnp.float32)
    pad_ref[:, Ho + 1:Ho + 2, :, :] = jnp.zeros((B, 1, Wpad, Cin), jnp.float32)
    pad_ref[:, :, 0:1, :] = jnp.zeros((B, Ho + 2, 1, Cin), jnp.float32)
    pad_ref[:, :, Wo + 1:Wpad, :] = jnp.zeros((B, Ho + 2, Wpad - Wo - 1, Cin),
                                              jnp.float32)
    pad_ref[:, 1:Ho + 1, 1:Wo + 1, :] = h

    acc2 = jnp.zeros((B, Ho, Wo, Cin), jnp.float32)
    for ki in range(3):
        for kj in range(3):
            acc2 = acc2 + (pad_ref[:, ki:ki + Ho, kj:kj + Wo, :]
                           * dw2_ref[ki * 3 + kj])

    # ---- 1x1 conv (Cin -> Cout, BN2 scale pre-folded) + bias + ReLU ---------
    lhs2 = acc2.reshape(B * Ho * Wo, Cin).astype(pw2_ref.dtype)
    h2 = jnp.dot(lhs2, pw2_ref[...], preferred_element_type=jnp.float32)
    h2 = jnp.maximum(h2 + b2_ref[...], 0.0)

    if fuse_gap:
        # Fused AdaptiveAvgPool2d(1): emit (B, Cout) directly, saving one full
        # activation HBM writeback + readback.
        s = jnp.sum(h2.reshape(B, Ho * Wo, Cout), axis=1)
        o_ref[...] = s * (1.0 / (Ho * Wo))
    else:
        o_ref[...] = h2.reshape(B, Ho, Wo, Cout)


# -----------------------------------------------------------------------------
# Standalone AdaptiveAvgPool2d(1) + flatten kernel (downsample=0 path),
# gridded over H tiles with a VMEM accumulator.
# -----------------------------------------------------------------------------
def _gap_kernel(x_ref, o_ref, acc_ref, *, inv_hw):
    @pl.when(pl.program_id(0) == 0)
    def _():
        acc_ref[...] = jnp.zeros_like(acc_ref)

    x = x_ref[...]                      # (N, th, W, C)
    s = jnp.sum(x, axis=2)              # reduce W (sublanes) -> (N, th, C)
    acc_ref[...] += jnp.sum(s, axis=1)  # reduce th           -> (N, C)

    @pl.when(pl.program_id(0) == pl.num_programs(0) - 1)
    def _():
        o_ref[...] = acc_ref[...] * inv_hw


# -----------------------------------------------------------------------------
# Wrappers
# -----------------------------------------------------------------------------
def _sepconv_block(x_nhwc, kp, *, fuse_gap):
    N, H, W, Cin = x_nhwc.shape
    Cout = kp["pw2_t"].shape[1]
    Ho, Wo = (H - 1) // 2 + 1, (W - 1) // 2 + 1
    Hp2, Wp2 = Ho + 1, Wo + 1
    Wpad = _round_up(Wo + 2, 8)

    # Zero-pad and split into the 4 stride-2 parity phases (~1x activation
    # traffic; replaces the previous 9x im2col tap tensor).
    xp = jnp.pad(x_nhwc,
                 ((0, 0), (1, 2 * Hp2 - H - 1), (1, 2 * Wp2 - W - 1), (0, 0)))
    ph = xp.reshape(N, Hp2, 2, Wp2, 2, Cin).transpose(0, 2, 4, 1, 3, 5)
    ph = ph.reshape(N, 4, Hp2, Wp2, Cin)

    # Batch elements per grid step, sized against the VMEM budget
    # (double-buffered in/out + scratch + slack for live values).
    per_b_bytes = 4 * (2 * 4 * Hp2 * Wp2 * Cin        # double-buffered phases
                       + 2 * Ho * Wo * Cout           # double-buffered output
                       + (Ho + 2) * Wpad * Cin        # padded scratch
                       + 4 * Ho * Wo * max(Cin, Cout))  # live-value slack
    B = _largest_divisor_leq(N, _VMEM_BUDGET // max(per_b_bytes, 1))
    # Fused-GAP output block is (B, Cout); keep its second-minor dim legal.
    fused = fuse_gap and (B == N or B % 8 == 0)

    kern = functools.partial(_sepconv_kernel, B=B, Ho=Ho, Wo=Wo, Cin=Cin,
                             Cout=Cout, Wpad=Wpad, fuse_gap=fused)

    def _full(shape):
        return pl.BlockSpec(shape, lambda n: (0,) * len(shape))

    if fused:
        out_shape = jax.ShapeDtypeStruct((N, Cout), jnp.float32)
        out_spec = pl.BlockSpec((B, Cout), lambda n: (n, 0))
    else:
        out_shape = jax.ShapeDtypeStruct((N, Ho, Wo, Cout), jnp.float32)
        out_spec = pl.BlockSpec((B, Ho, Wo, Cout), lambda n: (n, 0, 0, 0))

    out = pl.pallas_call(
        kern,
        out_shape=out_shape,
        grid_spec=pltpu.PrefetchScalarGridSpec(
            num_scalar_prefetch=0,
            grid=(N // B,),
            in_specs=[
                pl.BlockSpec((B, 4, Hp2, Wp2, Cin),
                             lambda n: (n, 0, 0, 0, 0)),
                _full((9, Cin)),                      # dw1 (flattened 3x3 taps)
                _full((Cin, Cin)),                    # pw1^T * bn1_scale
                _full((1, Cin)),                      # bn1 shift (bias)
                _full((9, Cin)),                      # dw2
                _full((Cin, Cout)),                   # pw2^T * bn2_scale
                _full((1, Cout)),                     # bn2 shift (bias)
            ],
            out_specs=out_spec,
            scratch_shapes=[pltpu.VMEM((B, Ho + 2, Wpad, Cin), jnp.float32)],
        ),
        compiler_params=pltpu.CompilerParams(
            dimension_semantics=("parallel",),        # batch steps independent
            vmem_limit_bytes=_VMEM_LIMIT),
    )(ph, kp["dw1"], kp["pw1_t"], kp["bn1_shift"],
      kp["dw2"], kp["pw2_t"], kp["bn2_shift"])
    return out, fused


def _global_avg_pool(x_nhwc):
    N, H, W, C = x_nhwc.shape
    # Tile H so one (N, th, W, C) slab (double-buffered) fits the VMEM budget.
    th_cap = _VMEM_BUDGET // max(1, 2 * 4 * N * W * C)
    th = _largest_divisor_leq(H, th_cap)
    kern = functools.partial(_gap_kernel, inv_hw=1.0 / (H * W))
    return pl.pallas_call(
        kern,
        out_shape=jax.ShapeDtypeStruct((N, C), jnp.float32),
        grid_spec=pltpu.PrefetchScalarGridSpec(
            num_scalar_prefetch=0,
            grid=(H // th,),
            in_specs=[pl.BlockSpec((N, th, W, C), lambda h: (0, h, 0, 0))],
            out_specs=pl.BlockSpec((N, C), lambda h: (0, 0)),
            scratch_shapes=[pltpu.VMEM((N, C), jnp.float32)],
        ),
        compiler_params=pltpu.CompilerParams(
            dimension_semantics=("arbitrary",),       # reduction over H tiles
            vmem_limit_bytes=_VMEM_LIMIT),
    )(x_nhwc)


# TODO(synk): BatchNorm2d is implemented in inference mode (folded running
# stats); training-mode batch statistics are not reproduced.
def _fold_params(p):
    cin = p["dw1"].shape[0]
    cout = p["pw2"].shape[0]
    # bf16 MXU path only pays off (and only matters) at real SENet widths.
    wdt = jnp.bfloat16 if cin >= 128 else jnp.float32

    def dw_flat(w):  # torch (C,1,3,3) -> (9, C), index k = ki*3 + kj
        return jnp.transpose(w.reshape(w.shape[0], 9), (1, 0))

    def bn_fold(bn):
        scale = bn["gamma"] / jnp.sqrt(bn["var"] + _EPS)
        shift = bn["beta"] - bn["mean"] * scale
        return scale, shift

    s1, t1 = bn_fold(p["bn1"])
    s2, t2 = bn_fold(p["bn2"])
    # Fold the BN scale into the 1x1-conv weights; keep only the shift as bias.
    pw1_t = jnp.transpose(p["pw1"].reshape(cin, cin), (1, 0)) * s1[None, :]
    pw2_t = jnp.transpose(p["pw2"].reshape(cout, cin), (1, 0)) * s2[None, :]
    return dict(
        dw1=dw_flat(p["dw1"]),
        pw1_t=pw1_t.astype(wdt), bn1_shift=t1.reshape(1, -1),
        dw2=dw_flat(p["dw2"]),
        pw2_t=pw2_t.astype(wdt), bn2_shift=t2.reshape(1, -1),
    )


def deepwise_aux_classifier_forward(x_nchw, block_params):
    """Matches DeepwiseAuxiliaryClassifier.forward: self.layer(x), then flatten.
    (self.fc is defined in __init__ but never used in forward.)"""
    x = jnp.transpose(x_nchw, (0, 2, 3, 1)).astype(jnp.float32)  # NCHW -> NHWC
    n = len(block_params)
    for i, p in enumerate(block_params):
        x, fused = _sepconv_block(x, _fold_params(p), fuse_gap=(i == n - 1))
        if fused:
            return x                       # GAP fused into the last SepConv
    return _global_avg_pool(x)             # AdaptiveAvgPool2d(1) + view(N, -1)


# -----------------------------------------------------------------------------
# Deterministic parameter init (shapes from SepConv.__init__) + pure-JAX ref
# -----------------------------------------------------------------------------
def _make_sepconv_params(key, cin):
    cout = 2 * cin
    k = jax.random.split(key, 12)
    unif = lambda kk, shape: jax.random.uniform(kk, shape, jnp.float32, -0.5, 0.5)
    return dict(
        dw1=unif(k[0], (cin, 1, 3, 3)),     # Conv2d(cin, cin, 3, s=2, p=1, groups=cin)
        pw1=unif(k[1], (cin, cin, 1, 1)),   # Conv2d(cin, cin, 1)
        bn1=dict(gamma=1.0 + 0.1 * unif(k[2], (cin,)),
                 beta=0.1 * unif(k[3], (cin,)),
                 mean=0.1 * unif(k[4], (cin,)),
                 var=1.0 + 0.5 * jnp.abs(unif(k[5], (cin,)))),
        dw2=unif(k[6], (cin, 1, 3, 3)),     # Conv2d(cin, cin, 3, s=1, p=1, groups=cin)
        pw2=unif(k[7], (cout, cin, 1, 1)),  # Conv2d(cin, cout, 1)
        bn2=dict(gamma=1.0 + 0.1 * unif(k[8], (cout,)),
                 beta=0.1 * unif(k[9], (cout,)),
                 mean=0.1 * unif(k[10], (cout,)),
                 var=1.0 + 0.5 * jnp.abs(unif(k[11], (cout,)))),
    )


def _bn_relu_ref(h, bn):
    scale = bn["gamma"] / jnp.sqrt(bn["var"] + _EPS)
    shift = bn["beta"] - bn["mean"] * scale
    h = h * scale.reshape(1, -1, 1, 1) + shift.reshape(1, -1, 1, 1)
    return jnp.maximum(h, 0.0)


def _reference_forward(x_nchw, block_params):
    dn = ("NCHW", "OIHW", "NCHW")
    h = x_nchw
    for p in block_params:
        c = h.shape[1]
        h = jax.lax.conv_general_dilated(h, p["dw1"], (2, 2), ((1, 1), (1, 1)),
                                         dimension_numbers=dn, feature_group_count=c)
        h = jax.lax.conv_general_dilated(h, p["pw1"], (1, 1), "VALID",
                                         dimension_numbers=dn)
        h = _bn_relu_ref(h, p["bn1"])
        h = jax.lax.conv_general_dilated(h, p["dw2"], (1, 1), ((1, 1), (1, 1)),
                                         dimension_numbers=dn, feature_group_count=c)
        h = jax.lax.conv_general_dilated(h, p["pw2"], (1, 1), "VALID",
                                         dimension_numbers=dn)
        h = _bn_relu_ref(h, p["bn2"])
    return jnp.mean(h, axis=(2, 3))


if __name__ == "__main__":
    key = jax.random.PRNGKey(0)
    kx, kparam = jax.random.split(key)

    N, C, H, W = 2, 4, 16, 16
    x = jax.random.normal(kx, (N, C, H, W), jnp.float32)

    def build_params(channel, downsample, k):
        params, ch = [], channel
        keys = jax.random.split(k, max(downsample, 1))
        for i in range(downsample):
            params.append(_make_sepconv_params(keys[i], ch))
            ch *= 2
        return params, ch

    # downsample=1: one SepConv(4 -> 8), global average pool fused in-kernel.
    bp1, ch1 = build_params(C, 1, kparam)
    out1 = jax.block_until_ready(deepwise_aux_classifier_forward(x, bp1))
    assert out1.shape == (N, ch1), out1.shape
    ref1 = _reference_forward(x, bp1)
    assert jnp.allclose(out1, ref1, rtol=2e-2, atol=2e-2), \
        float(jnp.max(jnp.abs(out1 - ref1)))

    # downsample=2: exercises the un-fused (intermediate) SepConv output path.
    bp2, ch2 = build_params(C, 2, jax.random.fold_in(kparam, 7))
    out2 = jax.block_until_ready(deepwise_aux_classifier_forward(x, bp2))
    assert out2.shape == (N, ch2), out2.shape
    ref2 = _reference_forward(x, bp2)
    assert jnp.allclose(out2, ref2, rtol=2e-2, atol=2e-2), \
        float(jnp.max(jnp.abs(out2 - ref2)))

    # downsample=0 (module default): the layer is just the global average pool.
    out0 = jax.block_until_ready(deepwise_aux_classifier_forward(x, []))
    ref0 = jnp.mean(x, axis=(2, 3))
    assert jnp.allclose(out0, ref0, rtol=1e-5, atol=1e-5)

    print("KERNEL_OK")
</pallas_src>

<mosaic_0001>
module attributes {stable_mosaic.version = 11 : i64} {
  func.func @_sepconv_kernel(%arg0: i32, %arg1: memref<2x4x9x9x4xf32, #tpu.memory_space<vmem>>, %arg2: memref<9x4xf32, #tpu.memory_space<vmem>>, %arg3: memref<4x4xf32, #tpu.memory_space<vmem>>, %arg4: memref<1x4xf32, #tpu.memory_space<vmem>>, %arg5: memref<9x4xf32, #tpu.memory_space<vmem>>, %arg6: memref<4x8xf32, #tpu.memory_space<vmem>>, %arg7: memref<1x8xf32, #tpu.memory_space<vmem>>, %arg8: memref<2x8xf32, #tpu.memory_space<vmem>>, %arg9: memref<2x10x16x4xf32, #tpu.memory_space<vmem>>) attributes {dimension_semantics = [#tpu.dimension_semantics<parallel>], iteration_bounds = array<i64: 1>, scalar_prefetch = 0 : i64, scratch_operands = 1 : i64, tpu.core_type = #tpu.core_type<tc>, window_params = [{transform_indices = @transform_0, window_bounds = array<i64: 2, 4, 9, 9, 4>}, {pipeline_mode = #tpu.pipeline_mode<synchronous>, transform_indices = @transform_1, window_bounds = array<i64: 9, 4>}, {pipeline_mode = #tpu.pipeline_mode<synchronous>, transform_indices = @transform_2, window_bounds = array<i64: 4, 4>}, {pipeline_mode = #tpu.pipeline_mode<synchronous>, transform_indices = @transform_3, window_bounds = array<i64: 1, 4>}, {pipeline_mode = #tpu.pipeline_mode<synchronous>, transform_indices = @transform_4, window_bounds = array<i64: 9, 4>}, {pipeline_mode = #tpu.pipeline_mode<synchronous>, transform_indices = @transform_5, window_bounds = array<i64: 4, 8>}, {pipeline_mode = #tpu.pipeline_mode<synchronous>, transform_indices = @transform_6, window_bounds = array<i64: 1, 8>}, {transform_indices = @transform_7, window_bounds = array<i64: 2, 8>}]} {
    %cst = arith.constant 0.000000e+00 : f32
    %0 = vector.broadcast %cst : f32 to vector<2x8x8x4xf32>
    %c0 = arith.constant 0 : index
    %c0_0 = arith.constant 0 : index
    %c0_1 = arith.constant 0 : index
    %c0_2 = arith.constant 0 : index
    %c0_3 = arith.constant 0 : index
    %1 = vector.load %arg1[%c0, %c0_0, %c0_1, %c0_2, %c0_3] : memref<2x4x9x9x4xf32, #tpu.memory_space<vmem>>, vector<2x1x8x8x4xf32>
    %2 = vector.shape_cast %1 : vector<2x1x8x8x4xf32> to vector<2x8x8x4xf32>
    %c0_4 = arith.constant 0 : index
    %c0_5 = arith.constant 0 : index
    %3 = vector.load %arg2[%c0_4, %c0_5] : memref<9x4xf32, #tpu.memory_space<vmem>>, vector<1x4xf32>
    %4 = vector.shape_cast %3 : vector<1x4xf32> to vector<4xf32>
    %5 = vector.shape_cast %4 : vector<4xf32> to vector<1x1x1x4xf32>
    %6 = vector.broadcast %5 : vector<1x1x1x4xf32> to vector<2x8x8x4xf32>
    %7 = arith.mulf %2, %6 : vector<2x8x8x4xf32>
    %8 = arith.addf %0, %7 : vector<2x8x8x4xf32>
    %c0_6 = arith.constant 0 : index
    %c1 = arith.constant 1 : index
    %c0_7 = arith.constant 0 : index
    %c0_8 = arith.constant 0 : index
    %c0_9 = arith.constant 0 : index
    %9 = vector.load %arg1[%c0_6, %c1, %c0_7, %c0_8, %c0_9] : memref<2x4x9x9x4xf32, #tpu.memory_space<vmem>>, vector<2x1x8x8x4xf32>
    %10 = vector.shape_cast %9 : vector<2x1x8x8x4xf32> to vector<2x8x8x4xf32>
    %c1_10 = arith.constant 1 : index
    %c0_11 = arith.constant 0 : index
    %11 = vector.load %arg2[%c1_10, %c0_11] : memref<9x4xf32, #tpu.memory_space<vmem>>, vector<1x4xf32>
    %12 = vector.shape_cast %11 : vector<1x4xf32> to vector<4xf32>
    %13 = vector.shape_cast %12 : vector<4xf32> to vector<1x1x1x4xf32>
    %14 = vector.broadcast %13 : vector<1x1x1x4xf32> to vector<2x8x8x4xf32>
    %15 = arith.mulf %10, %14 : vector<2x8x8x4xf32>
    %16 = arith.addf %8, %15 : vector<2x8x8x4xf32>
    %c0_12 = arith.constant 0 : index
    %c0_13 = arith.constant 0 : index
    %c0_14 = arith.constant 0 : index
    %c1_15 = arith.constant 1 : index
    %c0_16 = arith.constant 0 : index
    %17 = vector.load %arg1[%c0_12, %c0_13, %c0_14, %c1_15, %c0_16] : memref<2x4x9x9x4xf32, #tpu.memory_space<vmem>>, vector<2x1x8x8x4xf32>
    %18 = vector.shape_cast %17 : vector<2x1x8x8x4xf32> to vector<2x8x8x4xf32>
    %c2 = arith.constant 2 : index
    %c0_17 = arith.constant 0 : index
    %19 = vector.load %arg2[%c2, %c0_17] : memref<9x4xf32, #tpu.memory_space<vmem>>, vector<1x4xf32>
    %20 = vector.shape_cast %19 : vector<1x4xf32> to vector<4xf32>
    %21 = vector.shape_cast %20 : vector<4xf32> to vector<1x1x1x4xf32>
    %22 = vector.broadcast %21 : vector<1x1x1x4xf32> to vector<2x8x8x4xf32>
    %23 = arith.mulf %18, %22 : vector<2x8x8x4xf32>
    %24 = arith.addf %16, %23 : vector<2x8x8x4xf32>
    %c0_18 = arith.constant 0 : index
    %c2_19 = arith.constant 2 : index
    %c0_20 = arith.constant 0 : index
    %c0_21 = arith.constant 0 : index
    %c0_22 = arith.constant 0 : index
    %25 = vector.load %arg1[%c0_18, %c2_19, %c0_20, %c0_21, %c0_22] : memref<2x4x9x9x4xf32, #tpu.memory_space<vmem>>, vector<2x1x8x8x4xf32>
    %26 = vector.shape_cast %25 : vector<2x1x8x8x4xf32> to vector<2x8x8x4xf32>
    %c3 = arith.constant 3 : index
    %c0_23 = arith.constant 0 : index
    %27 = vector.load %arg2[%c3, %c0_23] : memref<9x4xf32, #tpu.memory_space<vmem>>, vector<1x4xf32>
    %28 = vector.shape_cast %27 : vector<1x4xf32> to vector<4xf32>
    %29 = vector.shape_cast %28 : vector<4xf32> to vector<1x1x1x4xf32>
    %30 = vector.broadcast %29 : vector<1x1x1x4xf32> to vector<2x8x8x4xf32>
    %31 = arith.mulf %26, %30 : vector<2x8x8x4xf32>
    %32 = arith.addf %24, %31 : vector<2x8x8x4xf32>
    %c0_24 = arith.constant 0 : index
    %c3_25 = arith.constant 3 : index
    %c0_26 = arith.constant 0 : index
    %c0_27 = arith.constant 0 : index
    %c0_28 = arith.constant 0 : index
    %33 = vector.load %arg1[%c0_24, %c3_25, %c0_26, %c0_27, %c0_28] : memref<2x4x9x9x4xf32, #tpu.memory_space<vmem>>, vector<2x1x8x8x4xf32>
    %34 = vector.shape_cast %33 : vector<2x1x8x8x4xf32> to vector<2x8x8x4xf32>
    %c4 = arith.constant 4 : index
    %c0_29 = arith.constant 0 : index
    %35 = vector.load %arg2[%c4, %c0_29] : memref<9x4xf32, #tpu.memory_space<vmem>>, vector<1x4xf32>
    %36 = vector.shape_cast %35 : vector<1x4xf32> to vector<4xf32>
    %37 = vector.shape_cast %36 : vector<4xf32> to vector<1x1x1x4xf32>
    %38 = vector.broadcast %37 : vector<1x1x1x4xf32> to vector<2x8x8x4xf32>
    %39 = arith.mulf %34, %38 : vector<2x8x8x4xf32>
    %40 = arith.addf %32, %39 : vector<2x8x8x4xf32>
    %c0_30 = arith.constant 0 : index
    %c2_31 = arith.constant 2 : index
    %c0_32 = arith.constant 0 : index
    %c1_33 = arith.constant 1 : index
    %c0_34 = arith.constant 0 : index
    %41 = vector.load %arg1[%c0_30, %c2_31, %c0_32, %c1_33, %c0_34] : memref<2x4x9x9x4xf32, #tpu.memory_space<vmem>>, vector<2x1x8x8x4xf32>
    %42 = vector.shape_cast %41 : vector<2x1x8x8x4xf32> to vector<2x8x8x4xf32>
    %c5 = arith.constant 5 : index
    %c0_35 = arith.constant 0 : index
    %43 = vector.load %arg2[%c5, %c0_35] : memref<9x4xf32, #tpu.memory_space<vmem>>, vector<1x4xf32>
    %44 = vector.shape_cast %43 : vector<1x4xf32> to vector<4xf32>
    %45 = vector.shape_cast %44 : vector<4xf32> to vector<1x1x1x4xf32>
    %46 = vector.broadcast %45 : vector<1x1x1x4xf32> to vector<2x8x8x4xf32>
    %47 = arith.mulf %42, %46 : vector<2x8x8x4xf32>
    %48 = arith.addf %40, %47 : vector<2x8x8x4xf32>
    %c0_36 = arith.constant 0 : index
    %c0_37 = arith.constant 0 : index
    %c1_38 = arith.constant 1 : index
    %c0_39 = arith.constant 0 : index
    %c0_40 = arith.constant 0 : index
    %49 = vector.load %arg1[%c0_36, %c0_37, %c1_38, %c0_39, %c0_40] : memref<2x4x9x9x4xf32, #tpu.memory_space<vmem>>, vector<2x1x8x8x4xf32>
    %50 = vector.shape_cast %49 : vector<2x1x8x8x4xf32> to vector<2x8x8x4xf32>
    %c6 = arith.constant 6 : index
    %c0_41 = arith.constant 0 : index
    %51 = vector.load %arg2[%c6, %c0_41] : memref<9x4xf32, #tpu.memory_space<vmem>>, vector<1x4xf32>
    %52 = vector.shape_cast %51 : vector<1x4xf32> to vector<4xf32>
    %53 = vector.shape_cast %52 : vector<4xf32> to vector<1x1x1x4xf32>
    %54 = vector.broadcast %53 : vector<1x1x1x4xf32> to vector<2x8x8x4xf32>
    %55 = arith.mulf %50, %54 : vector<2x8x8x4xf32>
    %56 = arith.addf %48, %55 : vector<2x8x8x4xf32>
    %c0_42 = arith.constant 0 : index
    %c1_43 = arith.constant 1 : index
    %c1_44 = arith.constant 1 : index
    %c0_45 = arith.constant 0 : index
    %c0_46 = arith.constant 0 : index
    %57 = vector.load %arg1[%c0_42, %c1_43, %c1_44, %c0_45, %c0_46] : memref<2x4x9x9x4xf32, #tpu.memory_space<vmem>>, vector<2x1x8x8x4xf32>
    %58 = vector.shape_cast %57 : vector<2x1x8x8x4xf32> to vector<2x8x8x4xf32>
    %c7 = arith.constant 7 : index
    %c0_47 = arith.constant 0 : index
    %59 = vector.load %arg2[%c7, %c0_47] : memref<9x4xf32, #tpu.memory_space<vmem>>, vector<1x4xf32>
    %60 = vector.shape_cast %59 : vector<1x4xf32> to vector<4xf32>
    %61 = vector.shape_cast %60 : vector<4xf32> to vector<1x1x1x4xf32>
    %62 = vector.broadcast %61 : vector<1x1x1x4xf32> to vector<2x8x8x4xf32>
    %63 = arith.mulf %58, %62 : vector<2x8x8x4xf32>
    %64 = arith.addf %56, %63 : vector<2x8x8x4xf32>
    %c0_48 = arith.constant 0 : index
    %c0_49 = arith.constant 0 : index
    %c1_50 = arith.constant 1 : index
    %c1_51 = arith.constant 1 : index
    %c0_52 = arith.constant 0 : index
    %65 = vector.load %arg1[%c0_48, %c0_49, %c1_50, %c1_51, %c0_52] : memref<2x4x9x9x4xf32, #tpu.memory_space<vmem>>, vector<2x1x8x8x4xf32>
    %66 = vector.shape_cast %65 : vector<2x1x8x8x4xf32> to vector<2x8x8x4xf32>
    %c8 = arith.constant 8 : index
    %c0_53 = arith.constant 0 : index
    %67 = vector.load %arg2[%c8, %c0_53] : memref<9x4xf32, #tpu.memory_space<vmem>>, vector<1x4xf32>
    %68 = vector.shape_cast %67 : vector<1x4xf32> to vector<4xf32>
    %69 = vector.shape_cast %68 : vector<4xf32> to vector<1x1x1x4xf32>
    %70 = vector.broadcast %69 : vector<1x1x1x4xf32> to vector<2x8x8x4xf32>
    %71 = arith.mulf %66, %70 : vector<2x8x8x4xf32>
    %72 = arith.addf %64, %71 : vector<2x8x8x4xf32>
    %73 = vector.shape_cast %72 : vector<2x8x8x4xf32> to vector<128x4xf32>
    %c0_54 = arith.constant 0 : index
    %c0_55 = arith.constant 0 : index
    %74 = vector.load %arg3[%c0_54, %c0_55] : memref<4x4xf32, #tpu.memory_space<vmem>>, vector<4x4xf32>
    %cst_56 = arith.constant dense<0.000000e+00> : vector<128x4xf32>
    %75 = tpu.matmul %73, %74, %cst_56 {dimension_numbers = #tpu.dot_dimension_numbers<[1], [0], [0], [1], [0, 0, 1, 1], [], []>} : vector<128x4xf32>, vector<4x4xf32>, vector<128x4xf32> -> vector<128x4xf32>
    %c0_57 = arith.constant 0 : index
    %c0_58 = arith.constant 0 : index
    %76 = vector.load %arg4[%c0_57, %c0_58] : memref<1x4xf32, #tpu.memory_space<vmem>>, vector<1x4xf32>
    %77 = vector.broadcast %76 : vector<1x4xf32> to vector<128x4xf32>
    %78 = arith.addf %75, %77 : vector<128x4xf32>
    %cst_59 = arith.constant 0.000000e+00 : f32
    %79 = vector.broadcast %cst_59 : f32 to vector<128x4xf32>
    %80 = arith.maximumf %78, %79 : vector<128x4xf32>
    %81 = vector.shape_cast %80 : vector<128x4xf32> to vector<2x8x8x4xf32>
    %cst_60 = arith.constant 0.000000e+00 : f32
    %82 = vector.broadcast %cst_60 : f32 to vector<2x1x16x4xf32>
    %c0_61 = arith.constant 0 : index
    %c0_62 = arith.constant 0 : index
    %c0_63 = arith.constant 0 : index
    %c0_64 = arith.constant 0 : index
    %83 = vector.load %arg9[%c0_61, %c0_62, %c0_63, %c0_64] : memref<2x10x16x4xf32, #tpu.memory_space<vmem>>, vector<2x1x16x4xf32>
    tpu.vector_store %arg9[%c0_61, %c0_62, %c0_63, %c0_64], %82 {strides = array<i32>} : memref<2x10x16x4xf32, #tpu.memory_space<vmem>>, vector<2x1x16x4xf32>,
    %cst_65 = arith.constant 0.000000e+00 : f32
    %84 = vector.broadcast %cst_65 : f32 to vector<2x1x16x4xf32>
    %c0_66 = arith.constant 0 : index
    %c9 = arith.constant 9 : index
    %c0_67 = arith.constant 0 : index
    %c0_68 = arith.constant 0 : index
    %85 = vector.load %arg9[%c0_66, %c9, %c0_67, %c0_68] : memref<2x10x16x4xf32, #tpu.memory_space<vmem>>, vector<2x1x16x4xf32>
    tpu.vector_store %arg9[%c0_66, %c9, %c0_67, %c0_68], %84 {strides = array<i32>} : memref<2x10x16x4xf32, #tpu.memory_space<vmem>>, vector<2x1x16x4xf32>,
    %cst_69 = arith.constant 0.000000e+00 : f32
    %86 = vector.broadcast %cst_69 : f32 to vector<2x10x1x4xf32>
    %c0_70 = arith.constant 0 : index
    %c0_71 = arith.constant 0 : index
    %c0_72 = arith.constant 0 : index
    %c0_73 = arith.constant 0 : index
    %87 = vector.load %arg9[%c0_70, %c0_71, %c0_72, %c0_73] : memref<2x10x16x4xf32, #tpu.memory_space<vmem>>, vector<2x10x1x4xf32>
    tpu.vector_store %arg9[%c0_70, %c0_71, %c0_72, %c0_73], %86 {strides = array<i32>} : memref<2x10x16x4xf32, #tpu.memory_space<vmem>>, vector<2x10x1x4xf32>,
    %cst_74 = arith.constant 0.000000e+00 : f32
    %88 = vector.broadcast %cst_74 : f32 to vector<2x10x7x4xf32>
    %c0_75 = arith.constant 0 : index
    %c0_76 = arith.constant 0 : index
    %c9_77 = arith.constant 9 : index
    %c0_78 = arith.constant 0 : index
    %89 = vector.load %arg9[%c0_75, %c0_76, %c9_77, %c0_78] : memref<2x10x16x4xf32, #tpu.memory_space<vmem>>, vector<2x10x7x4xf32>
    tpu.vector_store %arg9[%c0_75, %c0_76, %c9_77, %c0_78], %88 {strides = array<i32>} : memref<2x10x16x4xf32, #tpu.memory_space<vmem>>, vector<2x10x7x4xf32>,
    %c0_79 = arith.constant 0 : index
    %c1_80 = arith.constant 1 : index
    %c1_81 = arith.constant 1 : index
    %c0_82 = arith.constant 0 : index
    %90 = vector.load %arg9[%c0_79, %c1_80, %c1_81, %c0_82] : memref<2x10x16x4xf32, #tpu.memory_space<vmem>>, vector<2x8x8x4xf32>
    tpu.vector_store %arg9[%c0_79, %c1_80, %c1_81, %c0_82], %81 {strides = array<i32>} : memref<2x10x16x4xf32, #tpu.memory_space<vmem>>, vector<2x8x8x4xf32>,
    %cst_83 = arith.constant 0.000000e+00 : f32
    %91 = vector.broadcast %cst_83 : f32 to vector<2x8x8x4xf32>
    %c0_84 = arith.constant 0 : index
    %c0_85 = arith.constant 0 : index
    %c0_86 = arith.constant 0 : index
    %c0_87 = arith.constant 0 : index
    %92 = vector.load %arg9[%c0_84, %c0_85, %c0_86, %c0_87] : memref<2x10x16x4xf32, #tpu.memory_space<vmem>>, vector<2x8x8x4xf32>
    %c0_88 = arith.constant 0 : index
    %c0_89 = arith.constant 0 : index
    %93 = vector.load %arg5[%c0_88, %c0_89] : memref<9x4xf32, #tpu.memory_space<vmem>>, vector<1x4xf32>
    %94 = vector.shape_cast %93 : vector<1x4xf32> to vector<4xf32>
    %95 = vector.shape_cast %94 : vector<4xf32> to vector<1x1x1x4xf32>
    %96 = vector.broadcast %95 : vector<1x1x1x4xf32> to vector<2x8x8x4xf32>
    %97 = arith.mulf %92, %96 : vector<2x8x8x4xf32>
    %98 = arith.addf %91, %97 : vector<2x8x8x4xf32>
    %c0_90 = arith.constant 0 : index
    %c0_91 = arith.constant 0 : index
    %c1_92 = arith.constant 1 : index
    %c0_93 = arith.constant 0 : index
    %99 = vector.load %arg9[%c0_90, %c0_91, %c1_92, %c0_93] : memref<2x10x16x4xf32, #tpu.memory_space<vmem>>, vector<2x8x8x4xf32>
    %c1_94 = arith.constant 1 : index
    %c0_95 = arith.constant 0 : index
    %100 = vector.load %arg5[%c1_94, %c0_95] : memref<9x4xf32, #tpu.memory_space<vmem>>, vector<1x4xf32>
    %101 = vector.shape_cast %100 : vector<1x4xf32> to vector<4xf32>
    %102 = vector.shape_cast %101 : vector<4xf32> to vector<1x1x1x4xf32>
    %103 = vector.broadcast %102 : vector<1x1x1x4xf32> to vector<2x8x8x4xf32>
    %104 = arith.mulf %99, %103 : vector<2x8x8x4xf32>
    %105 = arith.addf %98, %104 : vector<2x8x8x4xf32>
    %c0_96 = arith.constant 0 : index
    %c0_97 = arith.constant 0 : index
    %c2_98 = arith.constant 2 : index
    %c0_99 = arith.constant 0 : index
    %106 = vector.load %arg9[%c0_96, %c0_97, %c2_98, %c0_99] : memref<2x10x16x4xf32, #tpu.memory_space<vmem>>, vector<2x8x8x4xf32>
    %c2_100 = arith.constant 2 : index
    %c0_101 = arith.constant 0 : index
    %107 = vector.load %arg5[%c2_100, %c0_101] : memref<9x4xf32, #tpu.memory_space<vmem>>, vector<1x4xf32>
    %108 = vector.shape_cast %107 : vector<1x4xf32> to vector<4xf32>
    %109 = vector.shape_cast %108 : vector<4xf32> to vector<1x1x1x4xf32>
    %110 = vector.broadcast %109 : vector<1x1x1x4xf32> to vector<2x8x8x4xf32>
    %111 = arith.mulf %106, %110 : vector<2x8x8x4xf32>
    %112 = arith.addf %105, %111 : vector<2x8x8x4xf32>
    %c0_102 = arith.constant 0 : index
    %c1_103 = arith.constant 1 : index
    %c0_104 = arith.constant 0 : index
    %c0_105 = arith.constant 0 : index
    %113 = vector.load %arg9[%c0_102, %c1_103, %c0_104, %c0_105] : memref<2x10x16x4xf32, #tpu.memory_space<vmem>>, vector<2x8x8x4xf32>
    %c3_106 = arith.constant 3 : index
    %c0_107 = arith.constant 0 : index
    %114 = vector.load %arg5[%c3_106, %c0_107] : memref<9x4xf32, #tpu.memory_space<vmem>>, vector<1x4xf32>
    %115 = vector.shape_cast %114 : vector<1x4xf32> to vector<4xf32>
    %116 = vector.shape_cast %115 : vector<4xf32> to vector<1x1x1x4xf32>
    %117 = vector.broadcast %116 : vector<1x1x1x4xf32> to vector<2x8x8x4xf32>
    %118 = arith.mulf %113, %117 : vector<2x8x8x4xf32>
    %119 = arith.addf %112, %118 : vector<2x8x8x4xf32>
    %c0_108 = arith.constant 0 : index
    %c1_109 = arith.constant 1 : index
    %c1_110 = arith.constant 1 : index
    %c0_111 = arith.constant 0 : index
    %120 = vector.load %arg9[%c0_108, %c1_109, %c1_110, %c0_111] : memref<2x10x16x4xf32, #tpu.memory_space<vmem>>, vector<2x8x8x4xf32>
    %c4_112 = arith.constant 4 : index
    %c0_113 = arith.constant 0 : index
    %121 = vector.load %arg5[%c4_112, %c0_113] : memref<9x4xf32, #tpu.memory_space<vmem>>, vector<1x4xf32>
    %122 = vector.shape_cast %121 : vector<1x4xf32> to vector<4xf32>
    %123 = vector.shape_cast %122 : vector<4xf32> to vector<1x1x1x4xf32>
    %124 = vector.broadcast %123 : vector<1x1x1x4xf32> to vector<2x8x8x4xf32>
    %125 = arith.mulf %120, %124 : vector<2x8x8x4xf32>
    %126 = arith.addf %119, %125 : vector<2x8x8x4xf32>
    %c0_114 = arith.constant 0 : index
    %c1_115 = arith.constant 1 : index
    %c2_116 = arith.constant 2 : index
    %c0_117 = arith.constant 0 : index
    %127 = vector.load %arg9[%c0_114, %c1_115, %c2_116, %c0_117] : memref<2x10x16x4xf32, #tpu.memory_space<vmem>>, vector<2x8x8x4xf32>
    %c5_118 = arith.constant 5 : index
    %c0_119 = arith.constant 0 : index
    %128 = vector.load %arg5[%c5_118, %c0_119] : memref<9x4xf32, #tpu.memory_space<vmem>>, vector<1x4xf32>
    %129 = vector.shape_cast %128 : vector<1x4xf32> to vector<4xf32>
    %130 = vector.shape_cast %129 : vector<4xf32> to vector<1x1x1x4xf32>
    %131 = vector.broadcast %130 : vector<1x1x1x4xf32> to vector<2x8x8x4xf32>
    %132 = arith.mulf %127, %131 : vector<2x8x8x4xf32>
    %133 = arith.addf %126, %132 : vector<2x8x8x4xf32>
    %c0_120 = arith.constant 0 : index
    %c2_121 = arith.constant 2 : index
    %c0_122 = arith.constant 0 : index
    %c0_123 = arith.constant 0 : index
    %134 = vector.load %arg9[%c0_120, %c2_121, %c0_122, %c0_123] : memref<2x10x16x4xf32, #tpu.memory_space<vmem>>, vector<2x8x8x4xf32>
    %c6_124 = arith.constant 6 : index
    %c0_125 = arith.constant 0 : index
    %135 = vector.load %arg5[%c6_124, %c0_125] : memref<9x4xf32, #tpu.memory_space<vmem>>, vector<1x4xf32>
    %136 = vector.shape_cast %135 : vector<1x4xf32> to vector<4xf32>
    %137 = vector.shape_cast %136 : vector<4xf32> to vector<1x1x1x4xf32>
    %138 = vector.broadcast %137 : vector<1x1x1x4xf32> to vector<2x8x8x4xf32>
    %139 = arith.mulf %134, %138 : vector<2x8x8x4xf32>
    %140 = arith.addf %133, %139 : vector<2x8x8x4xf32>
    %c0_126 = arith.constant 0 : index
    %c2_127 = arith.constant 2 : index
    %c1_128 = arith.constant 1 : index
    %c0_129 = arith.constant 0 : index
    %141 = vector.load %arg9[%c0_126, %c2_127, %c1_128, %c0_129] : memref<2x10x16x4xf32, #tpu.memory_space<vmem>>, vector<2x8x8x4xf32>
    %c7_130 = arith.constant 7 : index
    %c0_131 = arith.constant 0 : index
    %142 = vector.load %arg5[%c7_130, %c0_131] : memref<9x4xf32, #tpu.memory_space<vmem>>, vector<1x4xf32>
    %143 = vector.shape_cast %142 : vector<1x4xf32> to vector<4xf32>
    %144 = vector.shape_cast %143 : vector<4xf32> to vector<1x1x1x4xf32>
    %145 = vector.broadcast %144 : vector<1x1x1x4xf32> to vector<2x8x8x4xf32>
    %146 = arith.mulf %141, %145 : vector<2x8x8x4xf32>
    %147 = arith.addf %140, %146 : vector<2x8x8x4xf32>
    %c0_132 = arith.constant 0 : index
    %c2_133 = arith.constant 2 : index
    %c2_134 = arith.constant 2 : index
    %c0_135 = arith.constant 0 : index
    %148 = vector.load %arg9[%c0_132, %c2_133, %c2_134, %c0_135] : memref<2x10x16x4xf32, #tpu.memory_space<vmem>>, vector<2x8x8x4xf32>
    %c8_136 = arith.constant 8 : index
    %c0_137 = arith.constant 0 : index
    %149 = vector.load %arg5[%c8_136, %c0_137] : memref<9x4xf32, #tpu.memory_space<vmem>>, vector<1x4xf32>
    %150 = vector.shape_cast %149 : vector<1x4xf32> to vector<4xf32>
    %151 = vector.shape_cast %150 : vector<4xf32> to vector<1x1x1x4xf32>
    %152 = vector.broadcast %151 : vector<1x1x1x4xf32> to vector<2x8x8x4xf32>
    %153 = arith.mulf %148, %152 : vector<2x8x8x4xf32>
    %154 = arith.addf %147, %153 : vector<2x8x8x4xf32>
    %155 = vector.shape_cast %154 : vector<2x8x8x4xf32> to vector<128x4xf32>
    %c0_138 = arith.constant 0 : index
    %c0_139 = arith.constant 0 : index
    %156 = vector.load %arg6[%c0_138, %c0_139] : memref<4x8xf32, #tpu.memory_space<vmem>>, vector<4x8xf32>
    %cst_140 = arith.constant dense<0.000000e+00> : vector<128x8xf32>
    %157 = tpu.matmul %155, %156, %cst_140 {dimension_numbers = #tpu.dot_dimension_numbers<[1], [0], [0], [1], [0, 0, 1, 1], [], []>} : vector<128x4xf32>, vector<4x8xf32>, vector<128x8xf32> -> vector<128x8xf32>
    %c0_141 = arith.constant 0 : index
    %c0_142 = arith.constant 0 : index
    %158 = vector.load %arg7[%c0_141, %c0_142] : memref<1x8xf32, #tpu.memory_space<vmem>>, vector<1x8xf32>
    %159 = vector.broadcast %158 : vector<1x8xf32> to vector<128x8xf32>
    %160 = arith.addf %157, %159 : vector<128x8xf32>
    %cst_143 = arith.constant 0.000000e+00 : f32
    %161 = vector.broadcast %cst_143 : f32 to vector<128x8xf32>
    %162 = arith.maximumf %160, %161 : vector<128x8xf32>
    %163 = vector.shape_cast %162 : vector<128x8xf32> to vector<2x64x8xf32>
    %cst_144 = arith.constant dense<0.000000e+00> : vector<2x8xf32>
    %164 = vector.multi_reduction <add>, %163, %cst_144 [1] : vector<2x64x8xf32> to vector<2x8xf32>
    %cst_145 = arith.constant 1.562500e-02 : f32
    %165 = vector.broadcast %cst_145 : f32 to vector<2x8xf32>
    %166 = arith.mulf %164, %165 : vector<2x8xf32>
    %c0_146 = arith.constant 0 : index
    %c0_147 = arith.constant 0 : index
    %167 = vector.load %arg8[%c0_146, %c0_147] : memref<2x8xf32, #tpu.memory_space<vmem>>, vector<2x8xf32>
    tpu.vector_store %arg8[%c0_146, %c0_147], %166 {strides = array<i32>} : memref<2x8xf32, #tpu.memory_space<vmem>>, vector<2x8xf32>,
    return
  }
  func.func @transform_0(%arg0: i32) -> (i32, i32, i32, i32, i32) {
    %c0_i32 = arith.constant 0 : i32
    %c0_i32_0 = arith.constant 0 : i32
    %c0_i32_1 = arith.constant 0 : i32
    %c0_i32_2 = arith.constant 0 : i32
    %c0_i32_3 = arith.constant 0 : i32
    return %arg0, %c0_i32, %c0_i32_0, %c0_i32_1, %c0_i32_2 : i32, i32, i32, i32, i32
  }
  func.func @transform_1(%arg0: i32) -> (i32, i32) {
    %c0_i32 = arith.constant 0 : i32
    %c0_i32_0 = arith.constant 0 : i32
    %c0_i32_1 = arith.constant 0 : i32
    return %c0_i32, %c0_i32_0 : i32, i32
  }
  func.func @transform_2(%arg0: i32) -> (i32, i32) {
    %c0_i32 = arith.constant 0 : i32
    %c0_i32_0 = arith.constant 0 : i32
    %c0_i32_1 = arith.constant 0 : i32
    return %c0_i32, %c0_i32_0 : i32, i32
  }
  func.func @transform_3(%arg0: i32) -> (i32, i32) {
    %c0_i32 = arith.constant 0 : i32
    %c0_i32_0 = arith.constant 0 : i32
    %c0_i32_1 = arith.constant 0 : i32
    return %c0_i32, %c0_i32_0 : i32, i32
  }
  func.func @transform_4(%arg0: i32) -> (i32, i32) {
    %c0_i32 = arith.constant 0 : i32
    %c0_i32_0 = arith.constant 0 : i32
    %c0_i32_1 = arith.constant 0 : i32
    return %c0_i32, %c0_i32_0 : i32, i32
  }
  func.func @transform_5(%arg0: i32) -> (i32, i32) {
    %c0_i32 = arith.constant 0 : i32
    %c0_i32_0 = arith.constant 0 : i32
    %c0_i32_1 = arith.constant 0 : i32
    return %c0_i32, %c0_i32_0 : i32, i32
  }
  func.func @transform_6(%arg0: i32) -> (i32, i32) {
    %c0_i32 = arith.constant 0 : i32
    %c0_i32_0 = arith.constant 0 : i32
    %c0_i32_1 = arith.constant 0 : i32
    return %c0_i32, %c0_i32_0 : i32, i32
  }
  func.func @transform_7(%arg0: i32) -> (i32, i32) {
    %c0_i32 = arith.constant 0 : i32
    %c0_i32_0 = arith.constant 0 : i32
    return %arg0, %c0_i32 : i32, i32
  }
}

</mosaic_0001>

<bundles_post_ra>
// kernel: tpu_custom_call.1
= control target key start
LH: loop header
LB: loop body
LE: loop exit
PB: predicated region body
PF: predicated region fallthrough
CT: control target
= control target key end

     0   :  { %vm536_vm0 = vcmask 1043456   ;;  %vm487_vm1 = vcmask 31744   ;;  %s2528_s0 = inlined_call_operand.vmem [shape: f32[2,4,9,9,4], index: 0, kind: input, shape index: {}]   ;;  %s2529_s1 = inlined_call_operand.vmem [shape: f32[9,4], index: 1, kind: input, shape index: {}]   ;;  %s2530_s2 = inlined_call_operand.vmem [shape: f32[4,4], index: 2, kind: input, shape index: {}]   ;;  %s2531_s3 = inlined_call_operand.vmem [shape: f32[1,4], index: 3, kind: input, shape index: {}]   ;;  %s2532_s4 = inlined_call_operand.vmem [shape: f32[9,4], index: 4, kind: input, shape index: {}]   ;;  %s2533_s5 = inlined_call_operand.vmem [shape: f32[4,8], index: 5, kind: input, shape index: {}]   ;;  %s2534_s6 = inlined_call_operand.vmem [shape: f32[1,8], index: 6, kind: input, shape index: {}]   ;;  %s2535_s7 = inlined_call_operand.hbm [shape: f32[2,8], index: 7, kind: output, shape index: {}]  }
   0x1   :  { %v482_v0 = vld [vmem:[%s2530_s2] sm:$0xf]  ;;  %v1345_v3 = vld [vmem:[%s2528_s0 + $0x90] sm:$0xff]  ;;  %v1629_v13 = vld [vmem:[%s2529_s1 + $0x4] ss:$0 sm:$0xff] }
   0x2   :  { %v27_v1 = vld [vmem:[%s2528_s0] sm:$0xff]  ;;  %1457 = vmatpush.msk.msra.mxu0 %vm536_vm0, %v482_v0  ;;  %1491 = vmatpush.msk.msra.mxu2 %vm536_vm0, %v482_v0  ;;  %v1377_v12 = vld [vmem:[%s2528_s0 + $0x1b0] sm:$0xff]  ;;  %v1672_v31 = vld [vmem:[%s2529_s1 + $0x8] ss:$0 sm:$0xff] }
   0x3   :  { %v1594_v2 = vld [vmem:[%s2529_s1] ss:$0 sm:$0xff]  ;;  %v1602_v4 = vld [vmem:[%s2529_s1 + $0x1] ss:$0 sm:$0xff]  ;;  %v1611_v7 = vld [vmem:[%s2529_s1 + $0x2] ss:$0 sm:$0xff]  ;;  %v248_v21 = vmul.f32 %v1629_v13, %v1377_v12 }
   0x4   :  { %v128_v5 = vld [vmem:[%s2528_s0 + $0x1] sm:$0xff]  ;;  %v45_v6 = vmul.f32 %v1594_v2, %v27_v1  ;;  %v96_v9 = vmul.f32 %v1602_v4, %v1345_v3  ;;  %v1409_v17 = vld [vmem:[%s2528_s0 + $0x10] sm:$0xff] }
   0x5   :  { %v1361_v8 = vld [vmem:[%s2528_s0 + $0x120] sm:$0xff]  ;;  %v146_v11 = vmul.f32 %v1611_v7, %v128_v5  ;;  %v1441_v23 = vld [vmem:[%s2528_s0 + $0x11] sm:$0xff]  ;;  %v46_v27 = vmul.f32 %v1594_v2, %v1409_v17 }
   0x6   :  { %v1620_v10 = vld [vmem:[%s2529_s1 + $0x3] ss:$0 sm:$0xff]  ;;  %v112_v14 = vadd.f32 %v96_v9, %v45_v6  ;;  %v1635_v16 = vld [vmem:[%s2529_s1 + $0x5] ss:$0 sm:$0xff]  ;;  %v1650_v22 = vld [vmem:[%s2529_s1 + $0x6] ss:$0 sm:$0xff]  ;;  %v147_v38 = vmul.f32 %v1611_v7, %v1441_v23  ;;  %v450_v52 = vmul.f32 %v1672_v31, %v1441_v23 }
   0x7   :  { %v197_v15 = vmul.f32 %v1620_v10, %v1361_v8  ;;  %v1393_v18 = vld [vmem:[%s2528_s0 + $0x121] sm:$0xff]  ;;  %v1353_v26 = vld [vmem:[%s2528_s0 + $0x2d0] sm:$0xff]  ;;  %v349_v40 = vmul.f32 %v1650_v22, %v1409_v17 }
   0x8   :  { %v1425_v19 = vld [vmem:[%s2528_s0 + $0xa0] sm:$0xff]  ;;  %v162_v20 = vadd.f32 %v146_v11, %v112_v14  ;;  %v298_v30 = vmul.f32 %v1635_v16, %v1393_v18  ;;  %v104_v33 = vmul.f32 %v1602_v4, %v1353_v26  ;;  %v1385_v37 = vld [vmem:[%s2528_s0 + $0x3f0] sm:$0xff] }
   0x9   :  { %v1658_v24 = vld [vmem:[%s2529_s1 + $0x7] ss:$0 sm:$0xff]  ;;  %v97_v28 = vmul.f32 %v1602_v4, %v1425_v19  ;;  %v1362_v44 = vld [vmem:[%s2528_s0 + $0x130] sm:$0xff]  ;;  %v256_v54 = vmul.f32 %v1629_v13, %v1385_v37 }
   0xa   :  { %v35_v25 = vld [vmem:[%s2528_s0 + $0x240] sm:$0xff]  ;;  %v213_v29 = vadd.f32 %v197_v15, %v162_v20  ;;  %v400_v46 = vmul.f32 %v1658_v24, %v1425_v19  ;;  %v1417_v47 = vld [vmem:[%s2528_s0 + $0x250] sm:$0xff]  ;;  %v198_v50 = vmul.f32 %v1620_v10, %v1362_v44 }
   0xb   :  { %v53_v32 = vmul.f32 %v1594_v2, %v35_v25  ;;  %v136_v34 = vld [vmem:[%s2528_s0 + $0x241] sm:$0xff]  ;;  %v113_v49 = vadd.f32 %v97_v28, %v46_v27  ;;  %v1449_v55 = vld [vmem:[%s2528_s0 + $0x251] sm:$0xff]  ;;  %v357_v58 = vmul.f32 %v1650_v22, %v1417_v47  ;;  %v54_v0 = vmul.f32 %v1594_v2, %v1417_v47 }
   0xc   :  { %v1369_v35 = vld [vmem:[%s2528_s0 + $0x360] sm:$0xff]  ;;  %v154_v36 = vmul.f32 %v1611_v7, %v136_v34  ;;  %v264_v39 = vadd.f32 %v248_v21, %v213_v29  ;;  %v1394_v56 = vld [vmem:[%s2528_s0 + $0x131] sm:$0xff]  ;;  %v155_v11 = vmul.f32 %v1611_v7, %v1449_v55  ;;  %v458_v20 = vmul.f32 %v1672_v31, %v1449_v55 }
   0xd   :  { %v120_v41 = vadd.f32 %v104_v33, %v53_v32  ;;  %v205_v42 = vmul.f32 %v1620_v10, %v1369_v35  ;;  %v1401_v43 = vld [vmem:[%s2528_s0 + $0x361] sm:$0xff]  ;;  %v163_v59 = vadd.f32 %v147_v38, %v113_v49  ;;  %v1370_v61 = vld [vmem:[%s2528_s0 + $0x370] sm:$0xff]  ;;  %v299_v8 = vmul.f32 %v1635_v16, %v1394_v56 }
   0xe   :  { %v1378_v45 = vld [vmem:[%s2528_s0 + $0x1c0] sm:$0xff]  ;;  %v314_v51 = vadd.f32 %v298_v30, %v264_v39  ;;  %v306_v57 = vmul.f32 %v1635_v16, %v1401_v43  ;;  %v1426_v15 = vld [vmem:[%s2528_s0 + $0xb0] sm:$0xff]  ;;  %v206_v19 = vmul.f32 %v1620_v10, %v1370_v61 }
   0xf   :  { %v1433_v48 = vld [vmem:[%s2528_s0 + $0x2e0] sm:$0xff]  ;;  %v170_v53 = vadd.f32 %v154_v36, %v120_v41  ;;  %v249_v60 = vmul.f32 %v1629_v13, %v1378_v45  ;;  %v214_v6 = vadd.f32 %v198_v50, %v163_v59  ;;  %v1402_v26 = vld [vmem:[%s2528_s0 + $0x371] sm:$0xff]  ;;  %v401_v34 = vmul.f32 %v1658_v24, %v1426_v15 }
  0x10   :  { %v365_v62 = vadd.f32 %v349_v40, %v314_v51  ;;  %v105_v1 = vmul.f32 %v1602_v4, %v1433_v48  ;;  %v1386_v3 = vld [vmem:[%s2528_s0 + $0x400] sm:$0xff]  ;;  %v408_v5 = vmul.f32 %v1658_v24, %v1433_v48  ;;  %v98_v36 = vmul.f32 %v1602_v4, %v1426_v15  ;;  %v1379_v38 = vld [vmem:[%s2528_s0 + $0x1d0] sm:$0xff] }
  0x11   :  { %v221_v63 = vadd.f32 %v205_v42, %v170_v53  ;;  %v1410_v9 = vld [vmem:[%s2528_s0 + $0x20] sm:$0xff]  ;;  %v265_v21 = vadd.f32 %v249_v60, %v214_v6  ;;  %v257_v25 = vmul.f32 %v1629_v13, %v1386_v3  ;;  %v307_v42 = vmul.f32 %v1635_v16, %v1402_v26  ;;  %v1434_v43 = vld [vmem:[%s2528_s0 + $0x2f0] sm:$0xff] }
  0x12   :  { %v416_v12 = vadd.f32 %v400_v46, %v365_v62  ;;  %v1442_v17 = vld [vmem:[%s2528_s0 + $0x21] sm:$0xff]  ;;  %v121_v18 = vadd.f32 %v105_v1, %v54_v0  ;;  %v350_v23 = vmul.f32 %v1650_v22, %v1410_v9  ;;  %v47_v30 = vmul.f32 %v1594_v2, %v1410_v9  ;;  %v1387_v59 = vld [vmem:[%s2528_s0 + $0x410] sm:$0xff] }
  0x13   :  { %v272_v14 = vadd.f32 %v256_v54, %v221_v63  ;;  %v1363_v32 = vld [vmem:[%s2528_s0 + $0x140] sm:$0xff]  ;;  %v315_v33 = vadd.f32 %v299_v8, %v265_v21  ;;  %v148_v37 = vmul.f32 %v1611_v7, %v1442_v17  ;;  %v451_v40 = vmul.f32 %v1672_v31, %v1442_v17  ;;  %v1411_v0 = vld [vmem:[%s2528_s0 + $0x30] sm:$0xff] }
  0x14   :  { %v466_v27 = vadd.f32 %v450_v52, %v416_v12  ;;  %v171_v29 = vadd.f32 %v155_v11, %v121_v18  ;;  %v1418_v35 = vld [vmem:[%s2528_s0 + $0x260] sm:$0xff]  ;;  %v114_v47 = vadd.f32 %v98_v36, %v47_v30  ;;  %v199_v48 = vmul.f32 %v1620_v10, %v1363_v32  ;;  %v1443_v6 = vld [vmem:[%s2528_s0 + $0x31] sm:$0xff] }
  0x15   :  { %v322_v28 = vadd.f32 %v306_v57, %v272_v14  ;;  %v1450_v44 = vld [vmem:[%s2528_s0 + $0x261] sm:$0xff]  ;;  %v366_v45 = vadd.f32 %v350_v23, %v315_v33  ;;  %v358_v46 = vmul.f32 %v1650_v22, %v1418_v35  ;;  %v250_v52 = vmul.f32 %v1629_v13, %v1379_v38  ;;  %v1364_v18 = vld [vmem:[%s2528_s0 + $0x150] sm:$0xff] }
  0x16   :  { %1458 = vmatmul.msk.f32.vlgmr.msra.gmra.mxu0 %vm487_vm1, %v466_v27  ;;  %v222_v41 = vadd.f32 %v206_v19, %v171_v29  ;;  %v1395_v49 = vld [vmem:[%s2528_s0 + $0x141] sm:$0xff]  ;;  %v55_v53 = vmul.f32 %v1594_v2, %v1418_v35  ;;  %v164_v56 = vadd.f32 %v148_v37, %v114_v47  ;;  %v106_v57 = vmul.f32 %v1602_v4, %v1434_v43  ;;  %v1419_v29 = vld [vmem:[%s2528_s0 + $0x270] sm:$0xff] }
  0x17   :  { %v373_v39 = vadd.f32 %v357_v58, %v322_v28  ;;  %v1371_v54 = vld [vmem:[%s2528_s0 + $0x380] sm:$0xff]  ;;  %v417_v55 = vadd.f32 %v401_v34, %v366_v45  ;;  %v156_v58 = vmul.f32 %v1611_v7, %v1450_v44  ;;  %v409_v62 = vmul.f32 %v1658_v24, %v1434_v43  ;;  %v1451_v35 = vld [vmem:[%s2528_s0 + $0x271] sm:$0xff] }
  0x18   :  { %v273_v51 = vadd.f32 %v257_v25, %v222_v41  ;;  %v300_v63 = vmul.f32 %v1635_v16, %v1395_v49  ;;  %v1427_v1 = vld [vmem:[%s2528_s0 + $0xc0] sm:$0xff]  ;;  %v122_v8 = vadd.f32 %v106_v57, %v55_v53  ;;  %v207_v9 = vmul.f32 %v1620_v10, %v1371_v54  ;;  %v1372_v47 = vld [vmem:[%s2528_s0 + $0x390] sm:$0xff] }
  0x19   :  { %v424_v50 = vadd.f32 %v408_v5, %v373_v39  ;;  %v467_v3 = vadd.f32 %v451_v40, %v417_v55  ;;  %v215_v5 = vadd.f32 %v199_v48, %v164_v56  ;;  %v1403_v11 = vld [vmem:[%s2528_s0 + $0x381] sm:$0xff]  ;;  %v459_v14 = vmul.f32 %v1672_v31, %v1450_v44 }
  0x1a   :  { %v323_v61 = vadd.f32 %v307_v42, %v273_v51  ;;  %v351_v15 = vmul.f32 %v1650_v22, %v1411_v0  ;;  %v258_v17 = vmul.f32 %v1629_v13, %v1387_v59  ;;  %v48_v21 = vmul.f32 %v1594_v2, %v1411_v0  ;;  %v1380_v25 = vld [vmem:[%s2528_s0 + $0x1e0] sm:$0xff]  ;;  %v1396_v42 = vld [vmem:[%s2528_s0 + $0x151] sm:$0xff] }
  0x1b   :  { %v474_v60 = vadd.f32 %v458_v20, %v424_v50  ;;  %v266_v19 = vadd.f32 %v250_v52, %v215_v5  ;;  %v172_v20 = vadd.f32 %v156_v58, %v122_v8  ;;  %v99_v23 = vmul.f32 %v1602_v4, %v1427_v1  ;;  %v1435_v34 = vld [vmem:[%s2528_s0 + $0x300] sm:$0xff]  ;;  %v1428_v51 = vld [vmem:[%s2528_s0 + $0xd0] sm:$0xff] }
  0x1c   :  { %v374_v12 = vadd.f32 %v358_v46, %v323_v61  ;;  %v402_v27 = vmul.f32 %v1658_v24, %v1427_v1  ;;  %v308_v28 = vmul.f32 %v1635_v16, %v1403_v11  ;;  %v149_v30 = vmul.f32 %v1611_v7, %v1443_v6  ;;  %v1412_v50 = vld [vmem:[%s2528_s0 + $0x40] sm:$0xff] }
  0x1d   :  { %1466 = vmatmul.msk.f32.vlgmr.msra.gmra.mxu2 %vm487_vm1, %v474_v60  ;;  %v316_v32 = vadd.f32 %v300_v63, %v266_v19  ;;  %v223_v33 = vadd.f32 %v207_v9, %v172_v20  ;;  %v115_v36 = vadd.f32 %v99_v23, %v48_v21  ;;  %v200_v37 = vmul.f32 %v1620_v10, %v1364_v18  ;;  %v1444_v58 = vld [vmem:[%s2528_s0 + $0x41] sm:$0xff]  ;;  %v1404_v60 = vld [vmem:[%s2528_s0 + $0x391] sm:$0xff] }
  0x1e   :  { %1459 = vmatmul.msk.f32.gmra.mxu0 %vm487_vm1, %v467_v3  ;;  %v425_v26 = vadd.f32 %v409_v62, %v374_v12  ;;  %v452_v39 = vmul.f32 %v1672_v31, %v1443_v6  ;;  %v359_v40 = vmul.f32 %v1650_v22, %v1419_v29  ;;  %v251_v41 = vmul.f32 %v1629_v13, %v1380_v25  ;;  %v1388_v59 = vld [vmem:[%s2528_s0 + $0x420] sm:$0xff]  ;;  %v1436_v9 = vld [vmem:[%s2528_s0 + $0x310] sm:$0xff] }
  0x1f   :  { %v367_v43 = vadd.f32 %v351_v15, %v316_v32  ;;  %v274_v44 = vadd.f32 %v258_v17, %v223_v33  ;;  %v165_v45 = vadd.f32 %v149_v30, %v115_v36  ;;  %v56_v46 = vmul.f32 %v1594_v2, %v1419_v29  ;;  %v1420_v1 = vld [vmem:[%s2528_s0 + $0x280] sm:$0xff]  ;;  %v1381_v18 = vld [vmem:[%s2528_s0 + $0x1f0] sm:$0xff] }
  0x20   :  { %v475_v38 = vadd.f32 %v459_v14, %v425_v26  ;;  %v410_v48 = vmul.f32 %v1658_v24, %v1435_v34  ;;  %v460_v49 = vmul.f32 %v1672_v31, %v1451_v35  ;;  %v107_v52 = vmul.f32 %v1602_v4, %v1435_v34  ;;  %v1365_v3 = vld [vmem:[%s2528_s0 + $0x160] sm:$0xff] }
  0x21   :  { %v157_v53 = vmul.f32 %v1611_v7, %v1451_v35  ;;  %v418_v54 = vadd.f32 %v402_v27, %v367_v43  ;;  %v324_v55 = vadd.f32 %v308_v28, %v274_v44  ;;  %v216_v56 = vadd.f32 %v200_v37, %v165_v45  ;;  %v1452_v25 = vld [vmem:[%s2528_s0 + $0x281] sm:$0xff] }
  0x22   :  { %v301_v57 = vmul.f32 %v1635_v16, %v1396_v42  ;;  %v352_v61 = vmul.f32 %v1650_v22, %v1412_v50  ;;  %v403_v62 = vmul.f32 %v1658_v24, %v1428_v51  ;;  %v123_v63 = vadd.f32 %v107_v52, %v56_v46  ;;  %v1397_v30 = vld [vmem:[%s2528_s0 + $0x161] sm:$0xff] }
  0x23   :  { %v208_v0 = vmul.f32 %v1620_v10, %v1372_v47  ;;  %v468_v5 = vadd.f32 %v452_v39, %v418_v54  ;;  %v375_v6 = vadd.f32 %v359_v40, %v324_v55  ;;  %v267_v8 = vadd.f32 %v251_v41, %v216_v56  ;;  %v1373_v36 = vld [vmem:[%s2528_s0 + $0x3a0] sm:$0xff] }
  0x24   :  { %v49_v11 = vmul.f32 %v1594_v2, %v1412_v50  ;;  %v173_v12 = vadd.f32 %v157_v53, %v123_v63  ;;  %v259_v14 = vmul.f32 %v1629_v13, %v1388_v59  ;;  %v100_v15 = vmul.f32 %v1602_v4, %v1428_v51 }
  0x25   :  { %1467 = vmatmul.msk.f32.gmra.mxu2 %vm487_vm1, %v475_v38  ;;  %v150_v17 = vmul.f32 %v1611_v7, %v1444_v58  ;;  %v426_v19 = vadd.f32 %v410_v48, %v375_v6  ;;  %v317_v20 = vadd.f32 %v301_v57, %v267_v8  ;;  %v453_v21 = vmul.f32 %v1672_v31, %v1444_v58 }
  0x26   :  { %1460 = vmatmul.msk.f32.gmra.mxu0 %vm487_vm1, %v468_v5  ;;  %v309_v23 = vmul.f32 %v1635_v16, %v1404_v60  ;;  %v224_v26 = vadd.f32 %v208_v0, %v173_v12  ;;  %v360_v27 = vmul.f32 %v1650_v22, %v1420_v1  ;;  %v116_v28 = vadd.f32 %v100_v15, %v49_v11 }
  0x27   :  { %v201_v29 = vmul.f32 %v1620_v10, %v1365_v3  ;;  %v476_v32 = vadd.f32 %v460_v49, %v426_v19  ;;  %v368_v33 = vadd.f32 %v352_v61, %v317_v20  ;;  %v252_v34 = vmul.f32 %v1629_v13, %v1381_v18 }
  0x28   :  { %v57_v35 = vmul.f32 %v1594_v2, %v1420_v1 }
  0x29   :  { %12 = vsyncpa [#allocation4], 0  ;;  %v275_v37 = vadd.f32 %v259_v14, %v224_v26  ;;  %v166_v38 = vadd.f32 %v150_v17, %v116_v28  ;;  %v1413_v39 = vld [vmem:[%s2528_s0 + $0x50] sm:$0xff]  ;;  %v108_v40 = vmul.f32 %v1602_v4, %v1436_v9  ;;  %v158_v41 = vmul.f32 %v1611_v7, %v1452_v25  ;;  %v1429_v47 = vld [vmem:[%s2528_s0 + $0xe0] sm:$0xff]  ;;  %s1336_s23 = sshll.u32 %s2535_s7, 4  ;;  %s1337_s23 = int_to_ptr.hbm [resolvable:$true] %s1336_s23 }
  0x2a   :  { %v1389_v42 = vld [vmem:[%s2528_s0 + $0x430] sm:$0xff]  ;;  %v419_v43 = vadd.f32 %v403_v62, %v368_v33  ;;  %v411_v44 = vmul.f32 %v1658_v24, %v1436_v9  ;;  %v461_v45 = vmul.f32 %v1672_v31, %v1452_v25  ;;  %v302_v46 = vmul.f32 %v1635_v16, %v1397_v30  ;;  %v1405_v53 = vld [vmem:[%s2528_s0 + $0x3a1] sm:$0xff] }
  0x2b   :  { %v325_v48 = vadd.f32 %v309_v23, %v275_v37  ;;  %v217_v49 = vadd.f32 %v201_v29, %v166_v38  ;;  %v1445_v50 = vld [vmem:[%s2528_s0 + $0x51] sm:$0xff]  ;;  %v124_v51 = vadd.f32 %v108_v40, %v57_v35  ;;  %v209_v52 = vmul.f32 %v1620_v10, %v1373_v36  ;;  %v1382_v0 = vld [vmem:[%s2528_s0 + $0x200] sm:$0xff] }
  0x2c   :  { %v1366_v54 = vld [vmem:[%s2528_s0 + $0x170] sm:$0xff]  ;;  %v469_v55 = vadd.f32 %v453_v21, %v419_v43  ;;  %v353_v56 = vmul.f32 %v1650_v22, %v1413_v39  ;;  %v260_v57 = vmul.f32 %v1629_v13, %v1389_v42  ;;  %v50_v58 = vmul.f32 %v1594_v2, %v1413_v39  ;;  %v1437_v12 = vld [vmem:[%s2528_s0 + $0x320] sm:$0xff] }
  0x2d   :  { %1468 = vmatmul.msk.f32.gmra.mxu2 %vm487_vm1, %v476_v32  ;;  %v376_v59 = vadd.f32 %v360_v27, %v325_v48  ;;  %v268_v60 = vadd.f32 %v252_v34, %v217_v49  ;;  %v174_v61 = vadd.f32 %v158_v41, %v124_v51  ;;  %v1421_v62 = vld [vmem:[%s2528_s0 + $0x290] sm:$0xff]  ;;  %v101_v63 = vmul.f32 %v1602_v4, %v1429_v47  ;;  %v1414_v32 = vld [vmem:[%s2528_s0 + $0x60] sm:$0xff] }
  0x2e   :  { %1461 = vmatmul.msk.f32.gmra.mxu0 %vm487_vm1, %v469_v55  ;;  %v404_v1 = vmul.f32 %v1658_v24, %v1429_v47  ;;  %v310_v3 = vmul.f32 %v1635_v16, %v1405_v53  ;;  %v151_v5 = vmul.f32 %v1611_v7, %v1445_v50  ;;  %v202_v6 = vmul.f32 %v1620_v10, %v1366_v54  ;;  %v1453_v14 = vld [vmem:[%s2528_s0 + $0x291] sm:$0xff]  ;;  %v1446_v40 = vld [vmem:[%s2528_s0 + $0x61] sm:$0xff] }
  0x2f   :  { %v427_v8 = vadd.f32 %v411_v44, %v376_v59  ;;  %v318_v9 = vadd.f32 %v302_v46, %v268_v60  ;;  %v225_v11 = vadd.f32 %v209_v52, %v174_v61  ;;  %v117_v15 = vadd.f32 %v101_v63, %v50_v58  ;;  %v1398_v20 = vld [vmem:[%s2528_s0 + $0x171] sm:$0xff]  ;;  %v1390_v41 = vld [vmem:[%s2528_s0 + $0x440] sm:$0xff] }
  0x30   :  { %v454_v17 = vmul.f32 %v1672_v31, %v1445_v50  ;;  %v361_v18 = vmul.f32 %v1650_v22, %v1421_v62  ;;  %v253_v19 = vmul.f32 %v1629_v13, %v1382_v0  ;;  %v58_v21 = vmul.f32 %v1594_v2, %v1421_v62  ;;  %v1374_v28 = vld [vmem:[%s2528_s0 + $0x3b0] sm:$0xff]  ;;  %v1367_v51 = vld [vmem:[%s2528_s0 + $0x180] sm:$0xff] }
  0x31   :  { %v477_v23 = vadd.f32 %v461_v45, %v427_v8  ;;  %v369_v25 = vadd.f32 %v353_v56, %v318_v9  ;;  %v276_v26 = vadd.f32 %v260_v57, %v225_v11  ;;  %v167_v27 = vadd.f32 %v151_v5, %v117_v15  ;;  %v1430_v39 = vld [vmem:[%s2528_s0 + $0xf0] sm:$0xff]  ;;  %v1422_v54 = vld [vmem:[%s2528_s0 + $0x2a0] sm:$0xff] }
  0x32   :  { %v412_v29 = vmul.f32 %v1658_v24, %v1437_v12  ;;  %v462_v30 = vmul.f32 %v1672_v31, %v1453_v14  ;;  %v109_v33 = vmul.f32 %v1602_v4, %v1437_v12  ;;  %v159_v34 = vmul.f32 %v1611_v7, %v1453_v14  ;;  %v1406_v46 = vld [vmem:[%s2528_s0 + $0x3b1] sm:$0xff]  ;;  %v1454_v63 = vld [vmem:[%s2528_s0 + $0x2a1] sm:$0xff] }
  0x33   :  { %v420_v35 = vadd.f32 %v404_v1, %v369_v25  ;;  %v326_v36 = vadd.f32 %v310_v3, %v276_v26  ;;  %v218_v37 = vadd.f32 %v202_v6, %v167_v27  ;;  %v303_v38 = vmul.f32 %v1635_v16, %v1398_v20  ;;  %v1383_v57 = vld [vmem:[%s2528_s0 + $0x210] sm:$0xff]  ;;  %v1399_v6 = vld [vmem:[%s2528_s0 + $0x181] sm:$0xff] }
  0x34   :  { %v354_v42 = vmul.f32 %v1650_v22, %v1414_v32  ;;  %v405_v43 = vmul.f32 %v1658_v24, %v1430_v39  ;;  %v125_v44 = vadd.f32 %v109_v33, %v58_v21  ;;  %v210_v45 = vmul.f32 %v1620_v10, %v1374_v28  ;;  %v1438_v62 = vld [vmem:[%s2528_s0 + $0x330] sm:$0xff]  ;;  %v1375_v14 = vld [vmem:[%s2528_s0 + $0x3c0] sm:$0xff] }
  0x35   :  { %1469 = vmatmul.msk.f32.gmra.mxu2 %vm487_vm1, %v477_v23  ;;  %v470_v47 = vadd.f32 %v454_v17, %v420_v35  ;;  %v377_v48 = vadd.f32 %v361_v18, %v326_v36  ;;  %v269_v49 = vadd.f32 %v253_v19, %v218_v37  ;;  %v51_v50 = vmul.f32 %v1594_v2, %v1414_v32  ;;  %v1415_v18 = vld [vmem:[%s2528_s0 + $0x70] sm:$0xff]  ;;  %v1431_v28 = vld [vmem:[%s2528_s0 + $0x100] sm:$0xff] }
  0x36   :  { %v175_v52 = vadd.f32 %v159_v34, %v125_v44  ;;  %v261_v53 = vmul.f32 %v1629_v13, %v1390_v41  ;;  %v102_v55 = vmul.f32 %v1602_v4, %v1430_v39  ;;  %v152_v56 = vmul.f32 %v1611_v7, %v1446_v40  ;;  %v1391_v21 = vld [vmem:[%s2528_s0 + $0x450] sm:$0xff]  ;;  %v1407_v35 = vld [vmem:[%s2528_s0 + $0x3c1] sm:$0xff] }
  0x37   :  { %1462 = vmatmul.msk.f32.gmra.mxu0 %vm487_vm1, %v470_v47  ;;  %v428_v58 = vadd.f32 %v412_v29, %v377_v48  ;;  %v319_v59 = vadd.f32 %v303_v38, %v269_v49  ;;  %v455_v60 = vmul.f32 %v1672_v31, %v1446_v40  ;;  %v311_v61 = vmul.f32 %v1635_v16, %v1406_v46  ;;  %v1447_v32 = vld [vmem:[%s2528_s0 + $0x71] sm:$0xff]  ;;  %v1384_v46 = vld [vmem:[%s2528_s0 + $0x220] sm:$0xff] }
  0x38   :  { %v226_v0 = vadd.f32 %v210_v45, %v175_v52  ;;  %v362_v1 = vmul.f32 %v1650_v22, %v1422_v54  ;;  %v118_v3 = vadd.f32 %v102_v55, %v51_v50  ;;  %v203_v5 = vmul.f32 %v1620_v10, %v1367_v51  ;;  %v1368_v36 = vld [vmem:[%s2528_s0 + $0x190] sm:$0xff] }
  0x39   :  { %v478_v8 = vadd.f32 %v462_v30, %v428_v58  ;;  %v370_v9 = vadd.f32 %v354_v42, %v319_v59  ;;  %v254_v11 = vmul.f32 %v1629_v13, %v1383_v57  ;;  %v59_v12 = vmul.f32 %v1594_v2, %v1422_v54  ;;  %v1423_v44 = vld [vmem:[%s2528_s0 + $0x2b0] sm:$0xff]  ;;  %v1439_v54 = vld [vmem:[%s2528_s0 + $0x340] sm:$0xff] }
  0x3a   :  { %v277_v15 = vadd.f32 %v261_v53, %v226_v0  ;;  %v168_v17 = vadd.f32 %v152_v56, %v118_v3  ;;  %v110_v19 = vmul.f32 %v1602_v4, %v1438_v62  ;;  %v160_v20 = vmul.f32 %v1611_v7, %v1454_v63  ;;  %v1455_v55 = vld [vmem:[%s2528_s0 + $0x2b1] sm:$0xff] }
  0x3b   :  { %v421_v23 = vadd.f32 %v405_v43, %v370_v9  ;;  %v413_v25 = vmul.f32 %v1658_v24, %v1438_v62  ;;  %v463_v26 = vmul.f32 %v1672_v31, %v1454_v63  ;;  %v304_v27 = vmul.f32 %v1635_v16, %v1399_v6  ;;  %v1376_v3 = vld [vmem:[%s2528_s0 + $0x3d0] sm:$0xff]  ;;  %v1416_v6 = vld [vmem:[%s2528_s0 + $0x80] sm:$0xff] }
  0x3c   :  { %v327_v29 = vadd.f32 %v311_v61, %v277_v15  ;;  %v219_v30 = vadd.f32 %v203_v5, %v168_v17  ;;  %v126_v33 = vadd.f32 %v110_v19, %v59_v12  ;;  %v211_v34 = vmul.f32 %v1620_v10, %v1375_v14  ;;  %v1392_v15 = vld [vmem:[%s2528_s0 + $0x460] sm:$0xff] }
  0x3d   :  { %1470 = vmatmul.msk.f32.gmra.mxu2 %vm487_vm1, %v478_v8  ;;  %v471_v37 = vadd.f32 %v455_v60, %v421_v23  ;;  %v355_v38 = vmul.f32 %v1650_v22, %v1415_v18  ;;  %v262_v39 = vmul.f32 %v1629_v13, %v1391_v21  ;;  %v52_v40 = vmul.f32 %v1594_v2, %v1415_v18  ;;  %v1400_v60 = vld [vmem:[%s2528_s0 + $0x191] sm:$0xff] }
  0x3e   :  { %v378_v41 = vadd.f32 %v362_v1, %v327_v29  ;;  %v270_v42 = vadd.f32 %v254_v11, %v219_v30  ;;  %v176_v43 = vadd.f32 %v160_v20, %v126_v33  ;;  %v103_v45 = vmul.f32 %v1602_v4, %v1431_v28  ;;  %v1432_v18 = vld [vmem:[%s2528_s0 + $0x110] sm:$0xff] }
  0x3f   :  { %1463 = vmatmul.msk.f32.gmra.mxu0 %vm487_vm1, %v471_v37  ;;  %v406_v47 = vmul.f32 %v1658_v24, %v1431_v28  ;;  %v312_v48 = vmul.f32 %v1635_v16, %v1407_v35  ;;  %v153_v49 = vmul.f32 %v1611_v7, %v1447_v32  ;;  %v204_v50 = vmul.f32 %v1620_v10, %v1368_v36 }
  0x40   :  { %v429_v51 = vadd.f32 %v413_v25, %v378_v41  ;;  %v320_v52 = vadd.f32 %v304_v27, %v270_v42  ;;  %v227_v53 = vadd.f32 %v211_v34, %v176_v43  ;;  %v119_v56 = vadd.f32 %v103_v45, %v52_v40  ;;  %v1408_v25 = vld [vmem:[%s2528_s0 + $0x3d1] sm:$0xff]  ;;  %v1456_v41 = vld [vmem:[%s2528_s0 + $0x2c1] sm:$0xff] }
  0x41   :  { %v456_v57 = vmul.f32 %v1672_v31, %v1447_v32  ;;  %v363_v58 = vmul.f32 %v1650_v22, %v1423_v44  ;;  %v255_v59 = vmul.f32 %v1629_v13, %v1384_v46  ;;  %v60_v61 = vmul.f32 %v1594_v2, %v1423_v44  ;;  %v1424_v32 = vld [vmem:[%s2528_s0 + $0x2c0] sm:$0xff] }
  0x42   :  { %v479_v62 = vadd.f32 %v463_v26, %v429_v51  ;;  %v371_v63 = vadd.f32 %v355_v38, %v320_v52  ;;  %v278_v0 = vadd.f32 %v262_v39, %v227_v53  ;;  %v169_v1 = vadd.f32 %v153_v49, %v119_v56  ;;  %v1448_v26 = vld [vmem:[%s2528_s0 + $0x81] sm:$0xff] }
  0x43   :  { %v414_v5 = vmul.f32 %v1658_v24, %v1439_v54  ;;  %v111_v8 = vmul.f32 %v1602_v4, %v1439_v54  ;;  %v161_v9 = vmul.f32 %v1611_v7, %v1455_v55  ;;  %v305_v14 = vmul.f32 %v1635_v16, %v1400_v60  ;;  %v1140_v53 = vld [vmem:[%s2533_s5] sm:$0xf] }
  0x44   :  { %v422_v2 = vadd.f32 %v406_v47, %v371_v63  ;;  %v328_v11 = vadd.f32 %v312_v48, %v278_v0  ;;  %v220_v12 = vadd.f32 %v204_v50, %v169_v1  ;;  %v464_v17 = vmul.f32 %v1672_v31, %v1455_v55  ;;  %v2154_v48 = vld [vmem:[%s2532_s4 + $0x1] ss:$0 sm:$0xff]  ;;  %1474 = vmatpush.msk.msra.mxu1 %vm536_vm0, %v1140_v53  ;;  %v2193_v63 = vld [vmem:[%s2532_s4 + $0x3] ss:$0 sm:$0xff]  ;;  %v2198_v0 = vld [vmem:[%s2532_s4 + $0x4] ss:$0 sm:$0xff] }
  0x45   :  { %1471 = vmatmul.msk.f32.gmra.mxu2 %vm487_vm1, %v479_v62  ;;  %v127_v4 = vadd.f32 %v111_v8, %v60_v61  ;;  %v212_v7 = vmul.f32 %v1620_v10, %v1376_v3  ;;  %v356_v23 = vmul.f32 %v1650_v22, %v1416_v6  ;;  %v263_v28 = vmul.f32 %v1629_v13, %v1392_v15  ;;  %v1440_v13 = vld [vmem:[%s2528_s0 + $0x350] sm:$0xff] }
  0x46   :  { %v472_v19 = vadd.f32 %v456_v57, %v422_v2  ;;  %v379_v20 = vadd.f32 %v363_v58, %v328_v11  ;;  %v271_v21 = vadd.f32 %v255_v59, %v220_v12  ;;  %v407_v30 = vmul.f32 %v1658_v24, %v1432_v18  ;;  %1492 = vmatpush.msk.msra.mxu3 %vm536_vm0, %v1140_v53  ;;  %v2175_v57 = vld [vmem:[%s2532_s4 + $0x2] ss:$0 sm:$0xff] }
  0x47   :  { %v177_v27 = vadd.f32 %v161_v9, %v127_v4  ;;  %v313_v34 = vmul.f32 %v1635_v16, %v1408_v25  ;;  %v457_v37 = vmul.f32 %v1672_v31, %v1448_v26  ;;  %v364_v39 = vmul.f32 %v1650_v22, %v1424_v32  ;;  %v2231_v25 = vld [vmem:[%s2532_s4 + $0x6] ss:$0 sm:$0xff]  ;;  %v2236_v26 = vld [vmem:[%s2532_s4 + $0x7] ss:$0 sm:$0xff] }
  0x48   :  { %1464 = vmatmul.msk.f32.gmra.mxu0 %vm487_vm1, %v472_v19  ;;  %v430_v29 = vadd.f32 %v414_v5, %v379_v20  ;;  %v321_v10 = vadd.f32 %v305_v14, %v271_v21  ;;  %v415_v16 = vmul.f32 %v1658_v24, %v1440_v13  ;;  %v465_v45 = vmul.f32 %v1672_v31, %v1456_v41  ;;  %v2140_v24 = vld [vmem:[%s2531_s3] ss:$0 sm:$0xff]  ;;  %v2207_v5 = vld [vmem:[%s2532_s4 + $0x5] ss:$0 sm:$0xff] }
  0x49   :  { %v228_v33 = vadd.f32 %v212_v7, %v177_v27  ;;  %v1541_v22 = vmov 0.0   ;;  %vm630_vm2 = vcmask 24576   ;;  %vm651_vm3 = vcmask 30720   ;;  %v2149_v31 = vld [vmem:[%s2532_s4] ss:$0 sm:$0xff] }
  0x4a   :  { %v480_v35 = vadd.f32 %v464_v17, %v430_v29  ;;  %v372_v36 = vadd.f32 %v356_v23, %v321_v10  ;;  %621 = vst.msk [vmem:[#allocation2] sm:$0xff] %vm487_vm1, %v1541_v22  ;;  %vm1277_vm4 = vcmask 64512   ;;  %vm1324_vm5 = vcmask 1041409  }
  0x4b   :  { %v279_v38 = vadd.f32 %v263_v28, %v228_v33  ;;  %622 = vst.msk [vmem:[#allocation2 + $0x8] sm:$0xff] %vm487_vm1, %v1541_v22  ;;  %v2242_v28 = vld [vmem:[%s2532_s4 + $0x8] ss:$0 sm:$0xff]  ;;  %vm1327_vm6 = vcmask 58368  }
  0x4c   :  { %v423_v40 = vadd.f32 %v407_v30, %v372_v36  ;;  %631 = vst.msk [vmem:[#allocation2] sm:$0x1] %vm630_vm2, %v1541_v22 }
  0x4d   :  { %1472 = vmatmul.msk.f32.gmra.mxu2 %vm487_vm1, %v480_v35  ;;  %v329_v42 = vadd.f32 %v313_v34, %v279_v38  ;;  %632 = vst.msk [vmem:[#allocation2 + $0x10] sm:$0x1] %vm630_vm2, %v1541_v22 }
  0x4e   :  { %v473_v43 = vadd.f32 %v457_v37, %v423_v40  ;;  %633 = vst.msk [vmem:[#allocation2 + $0x20] sm:$0x1] %vm630_vm2, %v1541_v22 }
  0x4f   :  { %v380_v44 = vadd.f32 %v364_v39, %v329_v42  ;;  %652 = vst.msk [vmem:[#allocation2 + $0x9] sm:$0x7f] %vm651_vm3, %v1541_v22 }
  0x50   :  { %1465 = vmatmul.msk.f32.gmra.mxu0 %vm487_vm1, %v473_v43  ;;  %653 = vst.msk [vmem:[#allocation2 + $0x19] sm:$0x7f] %vm651_vm3, %v1541_v22 }
  0x51   :  { %v431_v46 = vadd.f32 %v415_v16, %v380_v44  ;;  %654 = vst.msk [vmem:[#allocation2 + $0x29] sm:$0x7f] %vm651_vm3, %v1541_v22 }
  0x52   :  { %623 = vst.msk [vmem:[#allocation2 + $0xa0] sm:$0xff] %vm487_vm1, %v1541_v22  ;;  %v739_v51 = vld [vmem:[#allocation2 + $0x1] sm:$0xff] }
  0x53   :  { %v481_v47 = vadd.f32 %v465_v45, %v431_v46  ;;  %624 = vst.msk [vmem:[#allocation2 + $0xa8] sm:$0xff] %vm487_vm1, %v1541_v22  ;;  %v689_v50 = vld [vmem:[#allocation2] sm:$0xff]  ;;  %v757_v56 = vmul.f32 %v2154_v48, %v739_v51 }
  0x54   :  { %626 = vst.msk [vmem:[#allocation2 + $0x90] sm:$0xff] %vm487_vm1, %v1541_v22  ;;  %v707_v55 = vmul.f32 %v2149_v31, %v689_v50 }
  0x55   :  { %1473 = vmatmul.msk.f32.gmra.mxu2 %vm487_vm1, %v481_v47  ;;  %627 = vst.msk [vmem:[#allocation2 + $0x98] sm:$0xff] %vm487_vm1, %v1541_v22 }
  0x56   :  { %628 = vst.msk [vmem:[#allocation2 + $0x130] sm:$0xff] %vm487_vm1, %v1541_v22  ;;  %v789_v58 = vld [vmem:[#allocation2 + $0x2] sm:$0xff]  ;;  %v773_v59 = vadd.f32 %v757_v56, %v707_v55 }
  0x57   :  { %629 = vst.msk [vmem:[#allocation2 + $0x138] sm:$0xff] %vm487_vm1, %v1541_v22  ;;  %v807_v60 = vmul.f32 %v2175_v57, %v789_v58 }
  0x58   :  { %634 = vst.msk [vmem:[#allocation2 + $0x30] sm:$0x1] %vm630_vm2, %v1541_v22 }
  0x59   :  { %635 = vst.msk [vmem:[#allocation2 + $0x40] sm:$0x1] %vm630_vm2, %v1541_v22  ;;  %v823_v3 = vadd.f32 %v807_v60, %v773_v59 }
  0x5a   :  { %636 = vst.msk [vmem:[#allocation2 + $0x50] sm:$0x1] %vm630_vm2, %v1541_v22  ;;  %v747_v56 = vld [vmem:[#allocation2 + $0xa1] sm:$0xff] }
  0x5b   :  { %637 = vst.msk [vmem:[#allocation2 + $0x60] sm:$0x1] %vm630_vm2, %v1541_v22 }
  0x5c   :  { %638 = vst.msk [vmem:[#allocation2 + $0x70] sm:$0x1] %vm630_vm2, %v1541_v22 }
  0x5d   :  { %639 = vst.msk [vmem:[#allocation2 + $0x80] sm:$0x1] %vm630_vm2, %v1541_v22 }
  0x5e   :  { %642 = vst.msk [vmem:[#allocation2 + $0xb0] sm:$0x1] %vm630_vm2, %v1541_v22 }
  0x5f   :  { %643 = vst.msk [vmem:[#allocation2 + $0xc0] sm:$0x1] %vm630_vm2, %v1541_v22 }
  0x60   :  { %644 = vst.msk [vmem:[#allocation2 + $0xd0] sm:$0x1] %vm630_vm2, %v1541_v22 }
  0x61   :  { %645 = vst.msk [vmem:[#allocation2 + $0xe0] sm:$0x1] %vm630_vm2, %v1541_v22 }
  0x62   :  { %646 = vst.msk [vmem:[#allocation2 + $0xf0] sm:$0x1] %vm630_vm2, %v1541_v22 }
  0x63   :  { %647 = vst.msk [vmem:[#allocation2 + $0x100] sm:$0x1] %vm630_vm2, %v1541_v22 }
  0x64   :  { %648 = vst.msk [vmem:[#allocation2 + $0x110] sm:$0x1] %vm630_vm2, %v1541_v22 }
  0x65   :  { %649 = vst.msk [vmem:[#allocation2 + $0x120] sm:$0x1] %vm630_vm2, %v1541_v22 }
  0x66   :  { %655 = vst.msk [vmem:[#allocation2 + $0x39] sm:$0x7f] %vm651_vm3, %v1541_v22 }
  0x67   :  { %656 = vst.msk [vmem:[#allocation2 + $0x49] sm:$0x7f] %vm651_vm3, %v1541_v22 }
  0x68   :  { %657 = vst.msk [vmem:[#allocation2 + $0x59] sm:$0x7f] %vm651_vm3, %v1541_v22 }
  0x69   :  { %658 = vst.msk [vmem:[#allocation2 + $0x69] sm:$0x7f] %vm651_vm3, %v1541_v22 }
  0x6a   :  { %659 = vst.msk [vmem:[#allocation2 + $0x79] sm:$0x7f] %vm651_vm3, %v1541_v22 }
  0x6b   :  { %660 = vst.msk [vmem:[#allocation2 + $0x89] sm:$0x7f] %vm651_vm3, %v1541_v22 }
  0x6c   :  { %663 = vst.msk [vmem:[#allocation2 + $0xb9] sm:$0x7f] %vm651_vm3, %v1541_v22 }
  0x6d   :  { %664 = vst.msk [vmem:[#allocation2 + $0xc9] sm:$0x7f] %vm651_vm3, %v1541_v22 }
  0x6e   :  { %665 = vst.msk [vmem:[#allocation2 + $0xd9] sm:$0x7f] %vm651_vm3, %v1541_v22 }
  0x6f   :  { %666 = vst.msk [vmem:[#allocation2 + $0xe9] sm:$0x7f] %vm651_vm3, %v1541_v22 }
  0x70   :  { %667 = vst.msk [vmem:[#allocation2 + $0xf9] sm:$0x7f] %vm651_vm3, %v1541_v22 }
  0x71   :  { %668 = vst.msk [vmem:[#allocation2 + $0x109] sm:$0x7f] %vm651_vm3, %v1541_v22 }
  0x72   :  { %669 = vst.msk [vmem:[#allocation2 + $0x119] sm:$0x7f] %vm651_vm3, %v1541_v22 }
  0x73   :  { %670 = vst.msk [vmem:[#allocation2 + $0x129] sm:$0x7f] %vm651_vm3, %v1541_v22 }
  0x74   :  { %640 = vst.msk [vmem:[#allocation2 + $0x90] sm:$0x1] %vm630_vm2, %v1541_v22 }
  0x75   :  { %641 = vst.msk [vmem:[#allocation2 + $0xa0] sm:$0x1] %vm630_vm2, %v1541_v22 }
  0x76   :  { %650 = vst.msk [vmem:[#allocation2 + $0x130] sm:$0x1] %vm630_vm2, %v1541_v22 }
  0x77   :  { %661 = vst.msk [vmem:[#allocation2 + $0x99] sm:$0x7f] %vm651_vm3, %v1541_v22 }
  0x78   :  { %662 = vst.msk [vmem:[#allocation2 + $0xa9] sm:$0x7f] %vm651_vm3, %v1541_v22 }
  0x79   :  { %671 = vst.msk [vmem:[#allocation2 + $0x139] sm:$0x7f] %vm651_vm3, %v1541_v22 }
  0x93   :  { %v557_v49 = vpop.f32.mrf.mxu0 }
  0x94   :  { %v558_v52 = vadd.f32 %v2140_v24, %v557_v49 }
  0x96   :  { %v605_v54 = vmax.f32 %v558_v52, 0.0 }
  0x98   :  { %673 = vst.msk [vmem:[#allocation2 + $0x11] sm:$0xff] %vm487_vm1, %v605_v54 }
  0x9b   :  { %v560_v61 = vpop.f32.mrf.mxu0 }
  0x9c   :  { %v561_v62 = vadd.f32 %v2140_v24, %v560_v61 }
  0x9e   :  { %v606_v1 = vmax.f32 %v561_v62, 0.0 }
  0x9f   :  { %v839_v8 = vld [vmem:[#allocation2 + $0x10] sm:$0xff] }
  0xa0   :  { %v581_v6 = vpop.f32.mrf.mxu2  ;;  %v889_v9 = vld [vmem:[#allocation2 + $0x11] sm:$0xff]  ;;  %674 = vst.msk [vmem:[#allocation2 + $0x21] sm:$0xff] %vm487_vm1, %v606_v1  ;;  %v857_v12 = vmul.f32 %v2193_v63, %v839_v8  ;;  %v708_v15 = vmul.f32 %v2149_v31, %v839_v8 }
  0xa1   :  { %v939_v2 = vld [vmem:[#allocation2 + $0x12] sm:$0xff]  ;;  %v582_v11 = vadd.f32 %v2140_v24, %v581_v6  ;;  %v907_v14 = vmul.f32 %v2198_v0, %v889_v9  ;;  %v758_v17 = vmul.f32 %v2154_v48, %v889_v9 }
  0xa2   :  { %v873_v4 = vadd.f32 %v857_v12, %v823_v3  ;;  %v957_v7 = vmul.f32 %v2207_v5, %v939_v2  ;;  %v808_v20 = vmul.f32 %v2175_v57, %v939_v2 }
  0xa3   :  { %v613_v18 = vmax.f32 %v582_v11, 0.0  ;;  %v774_v19 = vadd.f32 %v758_v17, %v708_v15  ;;  %v563_v21 = vpop.f32.mrf.mxu0  ;;  %v765_v11 = vmul.f32 %v2154_v48, %v747_v56 }
  0xa4   :  { %v923_v23 = vadd.f32 %v907_v14, %v873_v4  ;;  %v564_v27 = vadd.f32 %v2140_v24, %v563_v21 }
  0xa5   :  { %681 = vst.msk [vmem:[#allocation2 + $0xb1] sm:$0xff] %vm487_vm1, %v613_v18  ;;  %v824_v35 = vadd.f32 %v808_v20, %v774_v19 }
  0xa6   :  { %v973_v29 = vadd.f32 %v957_v7, %v923_v23  ;;  %v607_v30 = vmax.f32 %v564_v27, 0.0 }
  0xa7   :  { %v990_v32 = vld [vmem:[#allocation2 + $0x20] sm:$0xff] }
  0xa8   :  { %v584_v10 = vpop.f32.mrf.mxu2  ;;  %v1040_v33 = vld [vmem:[#allocation2 + $0x21] sm:$0xff]  ;;  %v1008_v37 = vmul.f32 %v2231_v25, %v990_v32  ;;  %675 = vst.msk [vmem:[#allocation2 + $0x31] sm:$0xff] %vm487_vm1, %v607_v30  ;;  %v858_v39 = vmul.f32 %v2193_v63, %v990_v32  ;;  %v709_v16 = vmul.f32 %v2149_v31, %v990_v32 }
  0xa9   :  { %v1090_v34 = vld [vmem:[#allocation2 + $0x22] sm:$0xff]  ;;  %v585_v36 = vadd.f32 %v2140_v24, %v584_v10  ;;  %v1058_v13 = vmul.f32 %v2236_v26, %v1040_v33  ;;  %v908_v40 = vmul.f32 %v2198_v0, %v1040_v33  ;;  %v759_v43 = vmul.f32 %v2154_v48, %v1040_v33 }
  0xaa   :  { %v1108_v38 = vmul.f32 %v2242_v28, %v1090_v34  ;;  %v1024_v42 = vadd.f32 %v1008_v37, %v973_v29  ;;  %v874_v46 = vadd.f32 %v858_v39, %v824_v35  ;;  %v958_v47 = vmul.f32 %v2207_v5, %v1090_v34  ;;  %v697_v29 = vld [vmem:[#allocation2 + $0xa0] sm:$0xff] }
  0xab   :  { %v614_v41 = vmax.f32 %v585_v36, 0.0  ;;  %v566_v49 = vpop.f32.mrf.mxu0  ;;  %v775_v58 = vadd.f32 %v759_v43, %v709_v16  ;;  %v809_v59 = vmul.f32 %v2175_v57, %v1090_v34  ;;  %v715_v35 = vmul.f32 %v2149_v31, %v697_v29 }
  0xac   :  { %v847_v44 = vld [vmem:[#allocation2 + $0xb0] sm:$0xff]  ;;  %v1074_v50 = vadd.f32 %v1058_v13, %v1024_v42  ;;  %v567_v51 = vadd.f32 %v2140_v24, %v566_v49  ;;  %v924_v52 = vadd.f32 %v908_v40, %v874_v46 }
  0xad   :  { %v897_v45 = vld [vmem:[#allocation2 + $0xb1] sm:$0xff]  ;;  %682 = vst.msk [vmem:[#allocation2 + $0xc1] sm:$0xff] %vm487_vm1, %v614_v41  ;;  %v716_v53 = vmul.f32 %v2149_v31, %v847_v44  ;;  %v865_v12 = vmul.f32 %v2193_v63, %v847_v44  ;;  %v825_v4 = vadd.f32 %v809_v59, %v775_v58  ;;  %v781_v43 = vadd.f32 %v765_v11, %v715_v35  ;;  %v797_v44 = vld [vmem:[#allocation2 + $0xa2] sm:$0xff] }
  0xae   :  { %v766_v54 = vmul.f32 %v2154_v48, %v897_v45  ;;  %v1124_v55 = vadd.f32 %v1108_v38, %v1074_v50  ;;  %v608_v61 = vmax.f32 %v567_v51, 0.0  ;;  %v947_v62 = vld [vmem:[#allocation2 + $0xb2] sm:$0xff]  ;;  %v974_v1 = vadd.f32 %v958_v47, %v924_v52 }
  0xaf   :  { %v991_v6 = vld [vmem:[#allocation2 + $0x30] sm:$0xff]  ;;  %v816_v18 = vmul.f32 %v2175_v57, %v947_v62  ;;  %v915_v19 = vmul.f32 %v2198_v0, %v897_v45  ;;  %v2292_v20 = vmul.f32 %v2207_v5, %v947_v62  ;;  %v815_v51 = vmul.f32 %v2175_v57, %v797_v44 }
  0xb0   :  { %v587_v60 = vpop.f32.mrf.mxu2  ;;  %1475 = vmatmul.msk.f32.vlgmr.msra.gmra.mxu1 %vm487_vm1, %v1124_v55  ;;  %v1041_v8 = vld [vmem:[#allocation2 + $0x31] sm:$0xff]  ;;  %v782_v2 = vadd.f32 %v766_v54, %v716_v53  ;;  %676 = vst.msk [vmem:[#allocation2 + $0x41] sm:$0xff] %vm487_vm1, %v608_v61  ;;  %v1009_v14 = vmul.f32 %v2231_v25, %v991_v6  ;;  %v859_v7 = vmul.f32 %v2193_v63, %v991_v6 }
  0xb1   :  { %v588_v3 = vadd.f32 %v2140_v24, %v587_v60  ;;  %v1091_v9 = vld [vmem:[#allocation2 + $0x32] sm:$0xff]  ;;  %v1059_v15 = vmul.f32 %v2236_v26, %v1041_v8  ;;  %v909_v32 = vmul.f32 %v2198_v0, %v1041_v8  ;;  %v710_v37 = vmul.f32 %v2149_v31, %v991_v6 }
  0xb2   :  { %v1025_v23 = vadd.f32 %v1009_v14, %v974_v1  ;;  %v1109_v27 = vmul.f32 %v2242_v28, %v1091_v9  ;;  %v832_v30 = vadd.f32 %v816_v18, %v782_v2  ;;  %v959_v33 = vmul.f32 %v2207_v5, %v1091_v9 }
  0xb3   :  { %v615_v17 = vmax.f32 %v588_v3, 0.0  ;;  %v760_v13 = vmul.f32 %v2154_v48, %v1041_v8  ;;  %v875_v40 = vadd.f32 %v859_v7, %v825_v4  ;;  %v810_v42 = vmul.f32 %v2175_v57, %v1091_v9 }
  0xb4   :  { %v998_v21 = vld [vmem:[#allocation2 + $0xc0] sm:$0xff]  ;;  %v569_v34 = vpop.f32.mrf.mxu0  ;;  %v1075_v36 = vadd.f32 %v1059_v15, %v1025_v23  ;;  %v831_v62 = vadd.f32 %v815_v51, %v781_v43 }
  0xb5   :  { %683 = vst.msk [vmem:[#allocation2 + $0xd1] sm:$0xff] %vm487_vm1, %v615_v17  ;;  %v1048_v10 = vld [vmem:[#allocation2 + $0xc1] sm:$0xff]  ;;  %v866_v22 = vmul.f32 %v2193_v63, %v998_v21  ;;  %v570_v38 = vadd.f32 %v2140_v24, %v569_v34  ;;  %v717_v41 = vmul.f32 %v2149_v31, %v998_v21  ;;  %v1016_v45 = vmul.f32 %v2231_v25, %v998_v21 }
  0xb6   :  { %v1098_v39 = vld [vmem:[#allocation2 + $0xc2] sm:$0xff]  ;;  %v1125_v46 = vadd.f32 %v1109_v27, %v1075_v36  ;;  %v767_v47 = vmul.f32 %v2154_v48, %v1048_v10  ;;  %v1066_v55 = vmul.f32 %v2236_v26, %v1048_v10  ;;  %v925_v58 = vadd.f32 %v909_v32, %v875_v40 }
  0xb7   :  { %v609_v50 = vmax.f32 %v570_v38, 0.0  ;;  %v882_v52 = vadd.f32 %v866_v22, %v832_v30  ;;  %v2309_v53 = vld [vmem:[#allocation2 + $0x40] sm:$0xff]  ;;  %v2315_v56 = vmul.f32 %v2242_v28, %v1098_v39  ;;  %v916_v1 = vmul.f32 %v2198_v0, %v1048_v10 }
  0xb8   :  { %v590_v16 = vpop.f32.mrf.mxu2  ;;  %v2311_v54 = vld [vmem:[#allocation2 + $0x41] sm:$0xff]  ;;  %1476 = vmatmul.msk.f32.gmra.mxu1 %vm487_vm1, %v1125_v46  ;;  %v1010_v59 = vmul.f32 %v2231_v25, %v2309_v53  ;;  %v783_v3 = vadd.f32 %v767_v47, %v717_v41  ;;  %v975_v8 = vadd.f32 %v959_v33, %v925_v58  ;;  %v817_v2 = vmul.f32 %v2175_v57, %v1098_v39 }
  0xb9   :  { %v591_v49 = vadd.f32 %v2140_v24, %v590_v16  ;;  %v2320_v60 = vld [vmem:[#allocation2 + $0x42] sm:$0xff]  ;;  %677 = vst.msk [vmem:[#allocation2 + $0x51] sm:$0xff] %vm487_vm1, %v609_v50  ;;  %v1060_v9 = vmul.f32 %v2236_v26, %v2311_v54  ;;  %v776_v11 = vadd.f32 %v760_v13, %v710_v37  ;;  %v881_v14 = vadd.f32 %v865_v12, %v831_v62 }
  0xba   :  { %v932_v15 = vadd.f32 %v916_v1, %v882_v52  ;;  %v966_v17 = vmul.f32 %v2207_v5, %v1098_v39  ;;  %v1110_v4 = vmul.f32 %v2242_v28, %v2320_v60  ;;  %v1026_v21 = vadd.f32 %v1010_v59, %v975_v8 }
  0xbb   :  { %v616_v61 = vmax.f32 %v591_v49, 0.0  ;;  %v833_v23 = vadd.f32 %v817_v2, %v783_v3  ;;  %v860_v29 = vmul.f32 %v2193_v63, %v2309_v53  ;;  %v931_v10 = vadd.f32 %v915_v19, %v881_v14 }
  0xbc   :  { %v999_v6 = vld [vmem:[#allocation2 + $0xd0] sm:$0xff]  ;;  %v572_v7 = vpop.f32.mrf.mxu0  ;;  %v910_v22 = vmul.f32 %v2198_v0, %v2311_v54  ;;  %v1076_v34 = vadd.f32 %v1060_v9, %v1026_v21  ;;  %v826_v37 = vadd.f32 %v810_v42, %v776_v11  ;;  %v982_v19 = vadd.f32 %v966_v17, %v932_v15 }
  0xbd   :  { %684 = vst.msk [vmem:[#allocation2 + $0xe1] sm:$0xff] %vm487_vm1, %v616_v61  ;;  %v1049_v18 = vld [vmem:[#allocation2 + $0xd1] sm:$0xff]  ;;  %v867_v27 = vmul.f32 %v2193_v63, %v999_v6  ;;  %v573_v30 = vadd.f32 %v2140_v24, %v572_v7  ;;  %v1017_v12 = vmul.f32 %v2231_v25, %v999_v6  ;;  %v981_v13 = vadd.f32 %v2292_v20, %v931_v10 }
  0xbe   :  { %v1099_v33 = vld [vmem:[#allocation2 + $0xd2] sm:$0xff]  ;;  %v917_v36 = vmul.f32 %v2198_v0, %v1049_v18  ;;  %v1126_v40 = vadd.f32 %v1110_v4, %v1076_v34  ;;  %v876_v16 = vadd.f32 %v860_v29, %v826_v37  ;;  %v960_v43 = vmul.f32 %v2207_v5, %v2320_v60 }
  0xbf   :  { %v883_v35 = vadd.f32 %v867_v27, %v833_v23  ;;  %v610_v39 = vmax.f32 %v573_v30, 0.0  ;;  %v1032_v47 = vadd.f32 %v1016_v45, %v981_v13  ;;  %v1067_v20 = vmul.f32 %v2236_v26, %v1049_v18 }
  0xc0   :  { %v593_v32 = vpop.f32.mrf.mxu2  ;;  %v2343_v44 = vld [vmem:[#allocation2 + $0x50] sm:$0xff]  ;;  %v967_v42 = vmul.f32 %v2207_v5, %v1099_v33  ;;  %v1033_v51 = vadd.f32 %v1017_v12, %v982_v19  ;;  %1477 = vmatmul.msk.f32.gmra.mxu1 %vm487_vm1, %v1126_v40  ;;  %v926_v59 = vadd.f32 %v910_v22, %v876_v16  ;;  %v718_v45 = vmul.f32 %v2149_v31, %v999_v6 }
  0xc1   :  { %v594_v38 = vadd.f32 %v2140_v24, %v593_v32  ;;  %v933_v41 = vadd.f32 %v917_v36, %v883_v35  ;;  %v2345_v46 = vld [vmem:[#allocation2 + $0x51] sm:$0xff]  ;;  %678 = vst.msk [vmem:[#allocation2 + $0x61] sm:$0xff] %vm487_vm1, %v610_v39  ;;  %v1011_v61 = vmul.f32 %v2231_v25, %v2343_v44  ;;  %v1082_v62 = vadd.f32 %v1066_v55, %v1032_v47 }
  0xc2   :  { %v2350_v50 = vld [vmem:[#allocation2 + $0x52] sm:$0xff]  ;;  %v1061_v8 = vmul.f32 %v2236_v26, %v2345_v46  ;;  %v976_v2 = vadd.f32 %v960_v43, %v926_v59  ;;  %v768_v14 = vmul.f32 %v2154_v48, %v1049_v18  ;;  %v818_v17 = vmul.f32 %v2175_v57, %v1099_v33 }
  0xc3   :  { %v617_v49 = vmax.f32 %v594_v38, 0.0  ;;  %v983_v1 = vadd.f32 %v967_v42, %v933_v41  ;;  %v1111_v11 = vmul.f32 %v2242_v28, %v2350_v50  ;;  %v1132_v15 = vadd.f32 %v2315_v56, %v1082_v62 }
  0xc4   :  { %v1000_v52 = vld [vmem:[#allocation2 + $0xe0] sm:$0xff]  ;;  %v1027_v23 = vadd.f32 %v1011_v61, %v976_v2  ;;  %v784_v27 = vadd.f32 %v768_v14, %v718_v45  ;;  %v711_v29 = vmul.f32 %v2149_v31, %v2309_v53  ;;  %v1083_v10 = vadd.f32 %v1067_v20, %v1033_v51 }
  0xc5   :  { %v1050_v58 = vld [vmem:[#allocation2 + $0xe1] sm:$0xff]  ;;  %685 = vst.msk [vmem:[#allocation2 + $0xf1] sm:$0xff] %vm487_vm1, %v617_v49  ;;  %v1018_v3 = vmul.f32 %v2231_v25, %v1000_v52  ;;  %v575_v6 = vpop.f32.mrf.mxu0  ;;  %v868_v4 = vmul.f32 %v2193_v63, %v1000_v52  ;;  %1483 = vmatmul.msk.f32.vlgmr.msra.gmra.mxu3 %vm487_vm1, %v1132_v15  ;;  %v761_v56 = vmul.f32 %v2154_v48, %v2311_v54 }
  0xc6   :  { %v1068_v9 = vmul.f32 %v2236_v26, %v1050_v58  ;;  %v576_v7 = vadd.f32 %v2140_v24, %v575_v6  ;;  %v1100_v21 = vld [vmem:[#allocation2 + $0xe2] sm:$0xff]  ;;  %v811_v12 = vmul.f32 %v2175_v57, %v2320_v60  ;;  %v1077_v34 = vadd.f32 %v1061_v8, %v1027_v23 }
  0xc7   :  { %v1034_v55 = vadd.f32 %v1018_v3, %v983_v1  ;;  %v834_v35 = vadd.f32 %v818_v17, %v784_v27  ;;  %v1117_v36 = vmul.f32 %v2242_v28, %v1099_v33  ;;  %v1118_v53 = vmul.f32 %v2242_v28, %v1100_v21 }
  0xc8   :  { %v596_v18 = vpop.f32.mrf.mxu2  ;;  %v611_v32 = vmax.f32 %v576_v7, 0.0  ;;  %v777_v37 = vadd.f32 %v761_v56, %v711_v29  ;;  %v861_v13 = vmul.f32 %v2193_v63, %v2343_v44  ;;  %v1127_v54 = vadd.f32 %v1111_v11, %v1077_v34  ;;  %v2385_v43 = vld [vmem:[#allocation2 + $0x60] sm:$0xff] }
  0xc9   :  { %v1084_v30 = vadd.f32 %v1068_v9, %v1034_v55  ;;  %v597_v22 = vadd.f32 %v2140_v24, %v596_v18  ;;  %v884_v39 = vadd.f32 %v868_v4, %v834_v35  ;;  %v918_v60 = vmul.f32 %v2198_v0, %v1050_v58  ;;  %v1044_v8 = vld [vmem:[#allocation2 + $0x61] sm:$0xff] }
  0xca   :  { %679 = vst.msk [vmem:[#allocation2 + $0x71] sm:$0xff] %vm487_vm1, %v611_v32  ;;  %v1133_v40 = vadd.f32 %v1117_v36, %v1083_v10  ;;  %v968_v41 = vmul.f32 %v2207_v5, %v1100_v21  ;;  %v827_v16 = vadd.f32 %v811_v12, %v777_v37  ;;  %v911_v33 = vmul.f32 %v2198_v0, %v2345_v46  ;;  %v1094_v15 = vld [vmem:[#allocation2 + $0x62] sm:$0xff] }
  0xcb   :  { %v618_v38 = vmax.f32 %v597_v22, 0.0  ;;  %v1134_v47 = vadd.f32 %v1118_v53, %v1084_v30  ;;  %1478 = vmatmul.msk.f32.gmra.mxu1 %vm487_vm1, %v1127_v54  ;;  %v934_v49 = vadd.f32 %v918_v60, %v884_v39  ;;  %v961_v59 = vmul.f32 %v2207_v5, %v2350_v50 }
  0xcc   :  { %v1001_v19 = vld [vmem:[#allocation2 + $0xf0] sm:$0xff]  ;;  %v877_v51 = vadd.f32 %v861_v13, %v827_v16  ;;  %v719_v61 = vmul.f32 %v2149_v31, %v1000_v52  ;;  %v769_v45 = vmul.f32 %v2154_v48, %v1050_v58  ;;  %v1012_v3 = vmul.f32 %v2231_v25, %v2385_v43 }
  0xcd   :  { %686 = vst.msk [vmem:[#allocation2 + $0x101] sm:$0xff] %vm487_vm1, %v618_v38  ;;  %v1019_v20 = vmul.f32 %v2231_v25, %v1001_v19  ;;  %v578_v42 = vpop.f32.mrf.mxu0  ;;  %v984_v1 = vadd.f32 %v968_v41, %v934_v49  ;;  %v819_v9 = vmul.f32 %v2175_v57, %v1100_v21  ;;  %1484 = vmatmul.msk.f32.gmra.mxu3 %vm487_vm1, %v1133_v40  ;;  %v1051_v11 = vld [vmem:[#allocation2 + $0xf1] sm:$0xff] }
  0xce   :  { %v579_v62 = vadd.f32 %v2140_v24, %v578_v42  ;;  %v927_v14 = vadd.f32 %v911_v33, %v877_v51  ;;  %v785_v6 = vadd.f32 %v769_v45, %v719_v61  ;;  %v869_v52 = vmul.f32 %v2193_v63, %v1001_v19  ;;  %v1101_v21 = vld [vmem:[#allocation2 + $0xf2] sm:$0xff] }
  0xcf   :  { %v712_v58 = vmul.f32 %v2149_v31, %v2343_v44  ;;  %v1035_v4 = vadd.f32 %v1019_v20, %v984_v1  ;;  %v762_v7 = vmul.f32 %v2154_v48, %v2345_v46  ;;  %v1062_v27 = vmul.f32 %v2236_v26, %v1044_v8 }
  0xd0   :  { %v599_v2 = vpop.f32.mrf.mxu2  ;;  %v612_v17 = vmax.f32 %v579_v62, 0.0  ;;  %v977_v23 = vadd.f32 %v961_v59, %v927_v14  ;;  %v835_v29 = vadd.f32 %v819_v9, %v785_v6  ;;  %v812_v10 = vmul.f32 %v2175_v57, %v2350_v50 }
  0xd1   :  { %v600_v55 = vadd.f32 %v2140_v24, %v599_v2  ;;  %v1069_v44 = vmul.f32 %v2236_v26, %v1051_v11  ;;  %v1112_v30 = vmul.f32 %v2242_v28, %v1094_v15  ;;  %v778_v56 = vadd.f32 %v762_v7, %v712_v58  ;;  %v2417_v53 = vld [vmem:[#allocation2 + $0x70] sm:$0xff] }
  0xd2   :  { %680 = vst.msk [vmem:[#allocation2 + $0x81] sm:$0xff] %vm487_vm1, %v612_v17  ;;  %v1028_v12 = vadd.f32 %v1012_v3, %v977_v23  ;;  %v885_v22 = vadd.f32 %v869_v52, %v835_v29  ;;  %v919_v46 = vmul.f32 %v2198_v0, %v1051_v11  ;;  %v862_v34 = vmul.f32 %v2193_v63, %v2385_v43  ;;  %v1045_v20 = vld [vmem:[#allocation2 + $0x71] sm:$0xff] }
  0xd3   :  { %v619_v18 = vmax.f32 %v600_v55, 0.0  ;;  %v1085_v35 = vadd.f32 %v1069_v44, %v1035_v4  ;;  %v1119_v50 = vmul.f32 %v2242_v28, %v1101_v21  ;;  %v969_v36 = vmul.f32 %v2207_v5, %v1101_v21  ;;  %v1095_v9 = vld [vmem:[#allocation2 + $0x72] sm:$0xff] }
  0xd4   :  { %v1002_v32 = vld [vmem:[#allocation2 + $0x100] sm:$0xff]  ;;  %v1078_v37 = vadd.f32 %v1062_v27, %v1028_v12  ;;  %v935_v13 = vadd.f32 %v919_v46, %v885_v22  ;;  %v828_v38 = vadd.f32 %v812_v10, %v778_v56  ;;  %v912_v54 = vmul.f32 %v2198_v0, %v1044_v8 }
  0xd5   :  { %687 = vst.msk [vmem:[#allocation2 + $0x111] sm:$0xff] %vm487_vm1, %v619_v18  ;;  %v1020_v39 = vmul.f32 %v2231_v25, %v1002_v32  ;;  %v962_v60 = vmul.f32 %v2207_v5, %v1094_v15  ;;  %v720_v40 = vmul.f32 %v2149_v31, %v1001_v19  ;;  %v770_v41 = vmul.f32 %v2154_v48, %v1051_v11  ;;  %v1052_v1 = vld [vmem:[#allocation2 + $0x101] sm:$0xff] }
  0xd6   :  { %1485 = vmatmul.msk.f32.gmra.mxu3 %vm487_vm1, %v1134_v47  ;;  %v1128_v16 = vadd.f32 %v1112_v30, %v1078_v37  ;;  %v878_v33 = vadd.f32 %v862_v34, %v828_v38  ;;  %v1013_v49 = vmul.f32 %v2231_v25, %v2417_v53  ;;  %v820_v42 = vmul.f32 %v2175_v57, %v1101_v21  ;;  %v1102_v14 = vld [vmem:[#allocation2 + $0x102] sm:$0xff] }
  0xd7   :  { %v985_v59 = vadd.f32 %v969_v36, %v935_v13  ;;  %v786_v61 = vadd.f32 %v770_v41, %v720_v40  ;;  %v870_v45 = vmul.f32 %v2193_v63, %v1002_v32  ;;  %v713_v19 = vmul.f32 %v2149_v31, %v2385_v43 }
  0xd8   :  { %v602_v51 = vpop.f32.mrf.mxu2  ;;  %v1135_v62 = vadd.f32 %v1119_v50, %v1085_v35  ;;  %1479 = vmatmul.msk.f32.gmra.mxu1 %vm487_vm1, %v1128_v16  ;;  %v928_v3 = vadd.f32 %v912_v54, %v878_v33  ;;  %v763_v2 = vmul.f32 %v2154_v48, %v1044_v8  ;;  %v1063_v6 = vmul.f32 %v2236_v26, %v1045_v20 }
  0xd9   :  { %v603_v47 = vadd.f32 %v2140_v24, %v602_v51  ;;  %v1036_v11 = vadd.f32 %v1020_v39, %v985_v59  ;;  %v836_v52 = vadd.f32 %v820_v42, %v786_v61  ;;  %v813_v58 = vmul.f32 %v2175_v57, %v1094_v15  ;;  %v996_v18 = vld [vmem:[#allocation2 + $0x80] sm:$0xff] }
  0xda   :  { %v978_v17 = vadd.f32 %v962_v60, %v928_v3  ;;  %v779_v4 = vadd.f32 %v763_v2, %v713_v19  ;;  %v863_v7 = vmul.f32 %v2193_v63, %v2417_v53  ;;  %v1070_v24 = vmul.f32 %v2236_v26, %v1052_v1  ;;  %v1046_v13 = vld [vmem:[#allocation2 + $0x81] sm:$0xff] }
  0xdb   :  { %v620_v55 = vmax.f32 %v603_v47, 0.0  ;;  %v1113_v21 = vmul.f32 %v2242_v28, %v1095_v9  ;;  %v886_v23 = vadd.f32 %v870_v45, %v836_v52  ;;  %v920_v8 = vmul.f32 %v2198_v0, %v1052_v1  ;;  %v1096_v33 = vld [vmem:[#allocation2 + $0x82] sm:$0xff] }
  0xdc   :  { %v1003_v43 = vld [vmem:[#allocation2 + $0x110] sm:$0xff]  ;;  %v1029_v27 = vadd.f32 %v1013_v49, %v978_v17  ;;  %v970_v29 = vmul.f32 %v2207_v5, %v1102_v14  ;;  %v829_v15 = vadd.f32 %v813_v58, %v779_v4  ;;  %v913_v10 = vmul.f32 %v2198_v0, %v1045_v20 }
  0xdd   :  { %688 = vst.msk [vmem:[#allocation2 + $0x121] sm:$0xff] %vm487_vm1, %v620_v55  ;;  %v1086_v44 = vadd.f32 %v1070_v24, %v1036_v11  ;;  %v936_v30 = vadd.f32 %v920_v8, %v886_v23  ;;  %v1021_v56 = vmul.f32 %v2231_v25, %v1003_v43  ;;  %v963_v12 = vmul.f32 %v2207_v5, %v1095_v9  ;;  %v1053_v39 = vld [vmem:[#allocation2 + $0x111] sm:$0xff] }
  0xde   :  { %1486 = vmatmul.msk.f32.gmra.mxu3 %vm487_vm1, %v1135_v62  ;;  %v1079_v22 = vadd.f32 %v1063_v6, %v1029_v27  ;;  %v879_v46 = vadd.f32 %v863_v7, %v829_v15  ;;  %v721_v34 = vmul.f32 %v2149_v31, %v1002_v32  ;;  %v771_v35 = vmul.f32 %v2154_v48, %v1052_v1  ;;  %v1103_v59 = vld [vmem:[#allocation2 + $0x112] sm:$0xff] }
  0xdf   :  { %v1120_v50 = vmul.f32 %v2242_v28, %v1102_v14  ;;  %v986_v36 = vadd.f32 %v970_v29, %v936_v30  ;;  %v1014_v37 = vmul.f32 %v2231_v25, %v996_v18  ;;  %v821_v38 = vmul.f32 %v2175_v57, %v1102_v14  ;;  %v997_v58 = vld [vmem:[#allocation2 + $0x90] sm:$0xff] }
  0xe0   :  { %v1129_v54 = vadd.f32 %v1113_v21, %v1079_v22  ;;  %v929_v60 = vadd.f32 %v913_v10, %v879_v46  ;;  %v787_v40 = vadd.f32 %v771_v35, %v721_v34  ;;  %v871_v41 = vmul.f32 %v2193_v63, %v1003_v43  ;;  %v1047_v10 = vld [vmem:[#allocation2 + $0x91] sm:$0xff] }
  0xe1   :  { %v1037_v16 = vadd.f32 %v1021_v56, %v986_v36  ;;  %v714_v32 = vmul.f32 %v2149_v31, %v2417_v53  ;;  %v764_v49 = vmul.f32 %v2154_v48, %v1045_v20  ;;  %v814_v42 = vmul.f32 %v2175_v57, %v1095_v9  ;;  %v1097_v22 = vld [vmem:[#allocation2 + $0x92] sm:$0xff] }
  0xe2   :  { %v1136_v51 = vadd.f32 %v1120_v50, %v1086_v44  ;;  %1480 = vmatmul.msk.f32.gmra.mxu1 %vm487_vm1, %v1129_v54  ;;  %v979_v61 = vadd.f32 %v963_v12, %v929_v60  ;;  %v1064_v45 = vmul.f32 %v2236_v26, %v1046_v13  ;;  %v837_v19 = vadd.f32 %v821_v38, %v787_v40  ;;  %v1005_v38 = vld [vmem:[#allocation2 + $0x130] sm:$0xff] }
  0xe3   :  { %v1071_v62 = vmul.f32 %v2236_v26, %v1053_v39  ;;  %v780_v1 = vadd.f32 %v764_v49, %v714_v32  ;;  %v864_v3 = vmul.f32 %v2193_v63, %v996_v18  ;;  %v1114_v53 = vmul.f32 %v2242_v28, %v1096_v33  ;;  %v1055_v32 = vld [vmem:[#allocation2 + $0x131] sm:$0xff] }
  0xe4   :  { %v1004_v47 = vld [vmem:[#allocation2 + $0x120] sm:$0xff]  ;;  %v1030_v2 = vadd.f32 %v1014_v37, %v979_v61  ;;  %v887_v20 = vadd.f32 %v871_v41, %v837_v19  ;;  %v921_v9 = vmul.f32 %v2198_v0, %v1053_v39  ;;  %v971_v14 = vmul.f32 %v2207_v5, %v1103_v59 }
  0xe5   :  { %v1087_v11 = vadd.f32 %v1071_v62, %v1037_v16  ;;  %v830_v6 = vadd.f32 %v814_v42, %v780_v1  ;;  %v914_v52 = vmul.f32 %v2198_v0, %v1046_v13  ;;  %v1022_v4 = vmul.f32 %v2231_v25, %v1004_v47  ;;  %v1054_v18 = vld [vmem:[#allocation2 + $0x121] sm:$0xff] }
  0xe6   :  { %1487 = vmatmul.msk.f32.gmra.mxu3 %vm487_vm1, %v1136_v51  ;;  %v1080_v55 = vadd.f32 %v1064_v45, %v1030_v2  ;;  %v937_v17 = vadd.f32 %v921_v9, %v887_v20  ;;  %v722_v7 = vmul.f32 %v2149_v31, %v1003_v43  ;;  %v964_v21 = vmul.f32 %v2207_v5, %v1096_v33  ;;  %v1104_v50 = vld [vmem:[#allocation2 + $0x122] sm:$0xff]  ;;  %v1105_v51 = vld [vmem:[#allocation2 + $0x132] sm:$0xff] }
  0xe7   :  { %v880_v24 = vadd.f32 %v864_v3, %v830_v6  ;;  %v772_v23 = vmul.f32 %v2154_v48, %v1053_v39  ;;  %v1121_v8 = vmul.f32 %v2242_v28, %v1103_v59  ;;  %v1015_v15 = vmul.f32 %v2231_v25, %v997_v58 }
  0xe8   :  { %v1130_v27 = vadd.f32 %v1114_v53, %v1080_v55  ;;  %v987_v29 = vadd.f32 %v971_v14, %v937_v17  ;;  %v822_v56 = vmul.f32 %v2175_v57, %v1103_v59  ;;  %v872_v12 = vmul.f32 %v2193_v63, %v1004_v47 }
  0xe9   :  { %v930_v44 = vadd.f32 %v914_v52, %v880_v24  ;;  %v788_v30 = vadd.f32 %v772_v23, %v722_v7  ;;  %v1137_v31 = vadd.f32 %v1121_v8, %v1087_v11  ;;  %v1065_v46 = vmul.f32 %v2236_v26, %v1047_v10 }
  0xea   :  { %1481 = vmatmul.msk.f32.gmra.mxu1 %vm487_vm1, %v1130_v27  ;;  %v1038_v43 = vadd.f32 %v1022_v4, %v987_v29  ;;  %v1072_v35 = vmul.f32 %v2236_v26, %v1054_v18  ;;  %v1115_v37 = vmul.f32 %v2242_v28, %v1097_v22  ;;  %v922_v57 = vmul.f32 %v2198_v0, %v1054_v18 }
  0xeb   :  { %v980_v48 = vadd.f32 %v964_v21, %v930_v44  ;;  %v838_v34 = vadd.f32 %v822_v56, %v788_v30  ;;  %v972_v60 = vmul.f32 %v2207_v5, %v1104_v50  ;;  %v1122_v40 = vmul.f32 %v2242_v28, %v1104_v50 }
  0xec   :  { %v1088_v63 = vadd.f32 %v1072_v35, %v1038_v43  ;;  %v1023_v41 = vmul.f32 %v2231_v25, %v1005_v38  ;;  %v1073_v0 = vmul.f32 %v2236_v26, %v1055_v32  ;;  %v1123_v61 = vmul.f32 %v2242_v28, %v1105_v51  ;;  %v2491_v26 = vld [vmem:[%s2534_s6] ss:$0 sm:$0xff]  ;;  %s1542_s6 = smov [#allocation3]  }
  0xed   :  { %v1031_v36 = vadd.f32 %v1015_v15, %v980_v48  ;;  %v888_v13 = vadd.f32 %v872_v12, %v838_v34  ;;  %s1334_s20 = sshll.u32 %s1542_s6, 4  ;;  %s1335_s20 = int_to_ptr.vmem [resolvable:$true] %s1334_s20 }
  0xee   :  { %1488 = vmatmul.msk.f32.gmra.mxu3 %vm487_vm1, %v1137_v31  ;;  %v1138_v49 = vadd.f32 %v1122_v40, %v1088_v63 }
  0xef   :  { %v1081_v54 = vadd.f32 %v1065_v46, %v1031_v36  ;;  %v938_v39 = vadd.f32 %v922_v57, %v888_v13 }
  0xf1   :  { %v1131_v16 = vadd.f32 %v1115_v37, %v1081_v54  ;;  %v988_v33 = vadd.f32 %v972_v60, %v938_v39 }
  0xf3   :  { %1482 = vmatmul.msk.f32.gmra.mxu1 %vm487_vm1, %v1131_v16  ;;  %v1039_v42 = vadd.f32 %v1023_v41, %v988_v33 }
  0xf5   :  { %v1089_v59 = vadd.f32 %v1073_v0, %v1039_v42 }
  0xf6   :  { %1489 = vmatmul.msk.f32.gmra.mxu3 %vm487_vm1, %v1138_v49 }
  0xf7   :  { %v1139_v5 = vadd.f32 %v1123_v61, %v1089_v59 }
  0xfe   :  { %1490 = vmatmul.msk.f32.gmra.mxu3 %vm487_vm1, %v1139_v5 }
 0x12d   :  { %v1213_v45 = vpop.f32.mrf.mxu1 }
 0x12e   :  { %v1214_v9 = vadd.f32 %v2491_v26, %v1213_v45 }
 0x130   :  { %v1261_v58 = vmax.f32 %v1214_v9, 0.0 }
 0x132   :  { %v1278_v23 = vsel %vm1277_vm4, %v1261_v58, 0.0 }
 0x135   :  { %v1216_v25 = vpop.f32.mrf.mxu1 }
 0x136   :  { %v1217_v28 = vadd.f32 %v2491_v26, %v1216_v25 }
 0x138   :  { %v1262_v14 = vmax.f32 %v1217_v28, 0.0 }
 0x13a   :  { %v1279_v7 = vsel %vm1277_vm4, %v1262_v14, 0.0 }
 0x13b   :  { %v1280_v15 = vadd.f32 %v1279_v7, %v1278_v23 }
 0x13d   :  { %v1219_v19 = vpop.f32.mrf.mxu1 }
 0x13e   :  { %v1220_v11 = vadd.f32 %v2491_v26, %v1219_v19 }
 0x140   :  { %v1263_v55 = vmax.f32 %v1220_v11, 0.0 }
 0x142   :  { %v1281_v8 = vsel %vm1277_vm4, %v1263_v55, 0.0 }
 0x143   :  { %v1282_v44 = vadd.f32 %v1281_v8, %v1280_v15 }
 0x148   :  { %v1237_v62 = vpop.f32.mrf.mxu3  ;;  %v1222_v47 = vpop.f32.mrf.mxu1 }
 0x149   :  { %v1223_v6 = vadd.f32 %v2491_v26, %v1222_v47  ;;  %v1238_v46 = vadd.f32 %v2491_v26, %v1237_v62 }
 0x14b   :  { %v1264_v24 = vmax.f32 %v1223_v6, 0.0  ;;  %v1269_v63 = vmax.f32 %v1238_v46, 0.0 }
 0x14d   :  { %v1283_v10 = vsel %vm1277_vm4, %v1264_v24, 0.0  ;;  %v1299_v42 = vsel %vm1277_vm4, %v1269_v63, 0.0 }
 0x14e   :  { %v1284_v43 = vadd.f32 %v1283_v10, %v1282_v44 }
 0x150   :  { %v1240_v1 = vpop.f32.mrf.mxu3 }
 0x151   :  { %v1241_v30 = vadd.f32 %v2491_v26, %v1240_v1 }
 0x153   :  { %v1270_v37 = vmax.f32 %v1241_v30, 0.0 }
 0x155   :  { %v1225_v3 = vpop.f32.mrf.mxu1  ;;  %v1300_v41 = vsel %vm1277_vm4, %v1270_v37, 0.0 }
 0x156   :  { %v1226_v17 = vadd.f32 %v2491_v26, %v1225_v3  ;;  %v1301_v61 = vadd.f32 %v1300_v41, %v1299_v42 }
 0x158   :  { %v1265_v27 = vmax.f32 %v1226_v17, 0.0 }
 0x159   :  { %v1243_v2 = vpop.f32.mrf.mxu3 }
 0x15a   :  { %v1285_v56 = vsel %vm1277_vm4, %v1265_v27, 0.0  ;;  %v1244_v34 = vadd.f32 %v2491_v26, %v1243_v2 }
 0x15b   :  { %v1286_v50 = vadd.f32 %v1285_v56, %v1284_v43 }
 0x15c   :  { %v1271_v54 = vmax.f32 %v1244_v34, 0.0 }
 0x15e   :  { %v1302_v0 = vsel %vm1277_vm4, %v1271_v54, 0.0 }
 0x15f   :  { %v1228_v53 = vpop.f32.mrf.mxu1  ;;  %v1303_v25 = vadd.f32 %v1302_v0, %v1301_v61 }
 0x160   :  { %v1229_v21 = vadd.f32 %v2491_v26, %v1228_v53 }
 0x161   :  { %v1246_v20 = vpop.f32.mrf.mxu3 }
 0x162   :  { %v1266_v18 = vmax.f32 %v1229_v21, 0.0  ;;  %v1247_v13 = vadd.f32 %v2491_v26, %v1246_v20 }
 0x164   :  { %v1287_v35 = vsel %vm1277_vm4, %v1266_v18, 0.0  ;;  %v1272_v16 = vmax.f32 %v1247_v13, 0.0 }
 0x165   :  { %v1288_v38 = vadd.f32 %v1287_v35, %v1286_v50 }
 0x166   :  { %v1304_v5 = vsel %vm1277_vm4, %v1272_v16, 0.0 }
 0x167   :  { %v1231_v52 = vpop.f32.mrf.mxu1  ;;  %v1305_v1 = vadd.f32 %v1304_v5, %v1303_v25 }
 0x168   :  { %v1232_v29 = vadd.f32 %v2491_v26, %v1231_v52 }
 0x169   :  { %v1249_v4 = vpop.f32.mrf.mxu3 }
 0x16a   :  { %v1267_v12 = vmax.f32 %v1232_v29, 0.0  ;;  %v1250_v39 = vadd.f32 %v2491_v26, %v1249_v4 }
 0x16c   :  { %v1289_v57 = vsel %vm1277_vm4, %v1267_v12, 0.0  ;;  %v1273_v51 = vmax.f32 %v1250_v39, 0.0 }
 0x16d   :  { %v1290_v40 = vadd.f32 %v1289_v57, %v1288_v38 }
 0x16e   :  { %v1306_v62 = vsel %vm1277_vm4, %v1273_v51, 0.0 }
 0x16f   :  { %v1307_v2 = vadd.f32 %v1306_v62, %v1305_v1 }
 0x170   :  { %v1234_v31 = vpop.f32.mrf.mxu1 }
 0x171   :  { %v1252_v22 = vpop.f32.mrf.mxu3  ;;  %v1235_v48 = vadd.f32 %v2491_v26, %v1234_v31 }
 0x172   :  { %v1253_v33 = vadd.f32 %v2491_v26, %v1252_v22 }
 0x173   :  { %v1268_v36 = vmax.f32 %v1235_v48, 0.0 }
 0x174   :  { %v1274_v45 = vmax.f32 %v1253_v33, 0.0 }
 0x175   :  { %v1291_v60 = vsel %vm1277_vm4, %v1268_v36, 0.0 }
 0x176   :  { %v1292_v32 = vadd.f32 %v1291_v60, %v1290_v40  ;;  %v1308_v3 = vsel %vm1277_vm4, %v1274_v45, 0.0 }
 0x177   :  { %v1309_v11 = vadd.f32 %v1308_v3, %v1307_v2 }
 0x178   :  { %v1293_v19 = vrot.slane %v1292_v32, 4 }
 0x179   :  { %v1255_v49 = vpop.f32.mrf.mxu3 }
 0x17a   :  { %v1256_v59 = vadd.f32 %v2491_v26, %v1255_v49  ;;  %v1294_v53 = vadd.f32 %v1293_v19, %v1292_v32 }
 0x17c   :  { %v1275_v47 = vmax.f32 %v1256_v59, 0.0  ;;  %v1295_v6 = vrot.slane %v1294_v53, 2 }
 0x17e   :  { %v1310_v28 = vsel %vm1277_vm4, %v1275_v47, 0.0  ;;  %v1296_v17 = vadd.f32 %v1295_v6, %v1294_v53 }
 0x17f   :  { %v1311_v52 = vadd.f32 %v1310_v28, %v1309_v11 }
 0x180   :  { %v1297_v24 = vrot.slane %v1296_v17, 1 }
 0x181   :  { %v1258_v20 = vpop.f32.mrf.mxu3 }
 0x182   :  { %v1259_v9 = vadd.f32 %v2491_v26, %v1258_v20  ;;  %v1298_v27 = vadd.f32 %v1297_v24, %v1296_v17 }
 0x184   :  { %v1276_v14 = vmax.f32 %v1259_v9, 0.0  ;;  %v1320_v26 = vmul.f32 0.015625, %v1298_v27 }
 0x186   :  { %v1312_v58 = vsel %vm1277_vm4, %v1276_v14, 0.0 }
 0x187   :  { %v1313_v55 = vadd.f32 %v1312_v58, %v1311_v52 }
 0x189   :  { %v1314_v4 = vrot.slane %v1313_v55, 4 }
 0x18b   :  { %v1315_v7 = vadd.f32 %v1314_v4, %v1313_v55 }
 0x18d   :  { %v1316_v21 = vrot.slane %v1315_v7, 2 }
 0x18f   :  { %v1317_v23 = vadd.f32 %v1316_v21, %v1315_v7 }
 0x191   :  { %v1318_v8 = vrot.slane %v1317_v23, 1 }
 0x193   :  { %v1319_v29 = vadd.f32 %v1318_v8, %v1317_v23 }
 0x195   :  { %v1321_v15 = vmul.f32 0.015625, %v1319_v29 }
 0x197   :  { %v1325_v10 = vsel %vm1324_vm5, %v1321_v15, %v1320_v26 }
 0x198   :  { %1328 = vst.msk [vmem:[#allocation3] sm:$0x3] %vm1327_vm6, %v1325_v10 }
 0x199   :  { %1339 = dma.vmem_to_hbm [thread:$0]  %s1335_s20, 32, %s1337_s23, [#allocation4]  }
 0x19a   :  { %1539 = dma.done.wait [#allocation4], 32  }
 0x19b   :  { %1540 = vsyncadd [#allocation4], 4294967264 }
 0x19c   :  { %1344 = vsyncpa [#allocation4], 1 }

</bundles_post_ra>
